<compile_context>
chip_gen: v7x
topology: tpu7x:2x2x1
jax: 0.10.0
libtpu: 0.0.40
codegen_flags: <defaults>
</compile_context>

<pallas_src>
import jax
import jax.numpy as jnp
from jax.experimental import pallas as pl
from jax.experimental.pallas import tpu as pltpu


# Hidden / padded dimensions.
D_IN = 6
D_IN_PAD = 8          # pad K=6 -> 8 (sublane granule)
D_H1 = 4096
D_OUT = 7
D_OUT_PAD = 128       # pad N=7 -> 128 (lane-dense output slab)
TB = 8                # batch tile (multiple of 8 sublanes)


def _mlp_kernel(x_ref, w1_ref, b1_ref, w23_ref, b23_ref, o_ref):
    # fc1 + ReLU   (bf16 operands, f32 accumulation on the MXU)
    h1 = jnp.dot(x_ref[...], w1_ref[...], preferred_element_type=jnp.float32)
    h1 = jnp.maximum(h1 + b1_ref[...], 0.0)
    # fused fc2+fc3 (no nonlinearity between them in forward())
    out = jnp.dot(h1.astype(jnp.bfloat16), w23_ref[...],
                  preferred_element_type=jnp.float32)
    o_ref[...] = (out + b23_ref[...]).astype(o_ref.dtype)


def prepare_kernel_params(params):
    """Fuse fc2/fc3 in f32, pad, and quantize weights to bf16."""
    w1, b1 = params["w1"], params["b1"]          # (6, 4096), (1, 4096)
    w2, b2 = params["w2"], params["b2"]          # (4096, 72), (1, 72)
    w3, b3 = params["w3"], params["b3"]          # (72, 7),   (1, 7)

    # Algebraic fusion (kept in f32).
    w23 = w2 @ w3                                # (4096, 7)
    b23 = b2 @ w3 + b3                           # (1, 7)

    # Pad fc1 contraction dim 6 -> 8 and fused output dim 7 -> 128.
    w1_p = jnp.zeros((D_IN_PAD, D_H1), jnp.float32).at[:D_IN, :].set(w1)
    w23_p = jnp.zeros((D_H1, D_OUT_PAD), jnp.float32).at[:, :D_OUT].set(w23)
    b23_p = jnp.zeros((1, D_OUT_PAD), jnp.float32).at[:, :D_OUT].set(b23)

    return {
        "w1": w1_p.astype(jnp.bfloat16),
        "b1": b1.astype(jnp.float32),            # biases stay f32
        "w23": w23_p.astype(jnp.bfloat16),
        "b23": b23_p.astype(jnp.float32),
    }


def net_forward(x, kparams):
    """x: (B, 6) float32. kparams: output of prepare_kernel_params."""
    B = x.shape[0]
    Bp = ((B + TB - 1) // TB) * TB

    # Pad batch to a multiple of TB, pad features 6 -> 8, cast to bf16.
    x_p = jnp.zeros((Bp, D_IN_PAD), jnp.float32).at[:B, :D_IN].set(x)
    x_p = x_p.astype(jnp.bfloat16)

    w1, b1 = kparams["w1"], kparams["b1"]
    w23, b23 = kparams["w23"], kparams["b23"]

    grid = (Bp // TB,)
    const = lambda shape: pl.BlockSpec(shape, lambda i: (0, 0))

    out = pl.pallas_call(
        _mlp_kernel,
        out_shape=jax.ShapeDtypeStruct((Bp, D_OUT_PAD), jnp.float32),
        grid=grid,
        in_specs=[
            pl.BlockSpec((TB, D_IN_PAD), lambda i: (i, 0)),   # x tile
            const(w1.shape), const(b1.shape),                 # weights stay resident
            const(w23.shape), const(b23.shape),
        ],
        out_specs=pl.BlockSpec((TB, D_OUT_PAD), lambda i: (i, 0)),
        compiler_params=pltpu.CompilerParams(
            dimension_semantics=("parallel",)),
    )(x_p, w1, b1, w23, b23)

    return out[:B, :D_OUT]


def init_params(key):
    """PyTorch-shaped params (weights stored transposed as (in, out), f32)."""
    dims = [(D_IN, D_H1), (D_H1, 72), (72, D_OUT)]
    params = {}
    keys = jax.random.split(key, 2 * len(dims))
    for i, (din, dout) in enumerate(dims):
        bound = 1.0 / jnp.sqrt(float(din))
        params[f"w{i + 1}"] = jax.random.uniform(
            keys[2 * i], (din, dout), jnp.float32, -bound, bound)
        params[f"b{i + 1}"] = jax.random.uniform(
            keys[2 * i + 1], (1, dout), jnp.float32, -bound, bound)
    return params


def _reference_forward(x, params):
    """Full-precision f32 reference matching the PyTorch forward()."""
    h1 = jnp.maximum(x @ params["w1"] + params["b1"], 0.0)
    h2 = h1 @ params["w2"] + params["b2"]
    return h2 @ params["w3"] + params["b3"]


if __name__ == "__main__":
    key = jax.random.PRNGKey(0)
    kx, kp = jax.random.split(key)

    B = 32
    x = jax.random.normal(kx, (B, D_IN), jnp.float32)
    params = init_params(kp)
    kparams = prepare_kernel_params(params)

    out = net_forward(x, kparams)
    out = jax.block_until_ready(out)

    ref = _reference_forward(x, params)
    assert out.shape == (B, D_OUT), out.shape
    # bf16 weights/activations introduce ~1e-3 absolute error vs the f32
    # reference (output magnitude ~0.2); tolerance relaxed accordingly.
    assert jnp.allclose(out, ref, atol=2e-2, rtol=2e-2), "mismatch vs JAX reference"

    print("KERNEL_OK")
</pallas_src>

<mosaic_0001>
module attributes {stable_mosaic.version = 11 : i64} {
  func.func @_mlp_kernel(%arg0: i32, %arg1: memref<8x8xbf16, #tpu.memory_space<vmem>>, %arg2: memref<8x4096xbf16, #tpu.memory_space<vmem>>, %arg3: memref<1x4096xf32, #tpu.memory_space<vmem>>, %arg4: memref<4096x128xbf16, #tpu.memory_space<vmem>>, %arg5: memref<1x128xf32, #tpu.memory_space<vmem>>, %arg6: memref<8x128xf32, #tpu.memory_space<vmem>>) attributes {dimension_semantics = [#tpu.dimension_semantics<parallel>], iteration_bounds = array<i64: 4>, scalar_prefetch = 0 : i64, scratch_operands = 0 : i64, tpu.core_type = #tpu.core_type<tc>, window_params = [{transform_indices = @transform_0, window_bounds = array<i64: 8, 8>}, {pipeline_mode = #tpu.pipeline_mode<synchronous>, transform_indices = @transform_1, window_bounds = array<i64: 8, 4096>}, {pipeline_mode = #tpu.pipeline_mode<synchronous>, transform_indices = @transform_2, window_bounds = array<i64: 1, 4096>}, {pipeline_mode = #tpu.pipeline_mode<synchronous>, transform_indices = @transform_3, window_bounds = array<i64: 4096, 128>}, {pipeline_mode = #tpu.pipeline_mode<synchronous>, transform_indices = @transform_4, window_bounds = array<i64: 1, 128>}, {transform_indices = @transform_5, window_bounds = array<i64: 8, 128>}]} {
    %c0 = arith.constant 0 : index
    %c0_0 = arith.constant 0 : index
    %0 = vector.load %arg1[%c0, %c0_0] : memref<8x8xbf16, #tpu.memory_space<vmem>>, vector<8x8xbf16>
    %c0_1 = arith.constant 0 : index
    %c0_2 = arith.constant 0 : index
    %1 = vector.load %arg2[%c0_1, %c0_2] : memref<8x4096xbf16, #tpu.memory_space<vmem>>, vector<8x4096xbf16>
    %cst = arith.constant dense<0.000000e+00> : vector<8x4096xf32>
    %2 = tpu.matmul %0, %1, %cst {dimension_numbers = #tpu.dot_dimension_numbers<[1], [0], [0], [1], [0, 0, 1, 1], [], []>} : vector<8x8xbf16>, vector<8x4096xbf16>, vector<8x4096xf32> -> vector<8x4096xf32>
    %c0_3 = arith.constant 0 : index
    %c0_4 = arith.constant 0 : index
    %3 = vector.load %arg3[%c0_3, %c0_4] : memref<1x4096xf32, #tpu.memory_space<vmem>>, vector<1x4096xf32>
    %4 = vector.broadcast %3 : vector<1x4096xf32> to vector<8x4096xf32>
    %5 = arith.addf %2, %4 : vector<8x4096xf32>
    %cst_5 = arith.constant 0.000000e+00 : f32
    %6 = vector.broadcast %cst_5 : f32 to vector<8x4096xf32>
    %7 = arith.maximumf %5, %6 : vector<8x4096xf32>
    %8 = arith.truncf %7 : vector<8x4096xf32> to vector<8x4096xbf16>
    %c0_6 = arith.constant 0 : index
    %c0_7 = arith.constant 0 : index
    %9 = vector.load %arg4[%c0_6, %c0_7] : memref<4096x128xbf16, #tpu.memory_space<vmem>>, vector<4096x128xbf16>
    %cst_8 = arith.constant dense<0.000000e+00> : vector<8x128xf32>
    %10 = tpu.matmul %8, %9, %cst_8 {dimension_numbers = #tpu.dot_dimension_numbers<[1], [0], [0], [1], [0, 0, 1, 1], [], []>} : vector<8x4096xbf16>, vector<4096x128xbf16>, vector<8x128xf32> -> vector<8x128xf32>
    %c0_9 = arith.constant 0 : index
    %c0_10 = arith.constant 0 : index
    %11 = vector.load %arg5[%c0_9, %c0_10] : memref<1x128xf32, #tpu.memory_space<vmem>>, vector<1x128xf32>
    %12 = vector.broadcast %11 : vector<1x128xf32> to vector<8x128xf32>
    %13 = arith.addf %10, %12 : vector<8x128xf32>
    %c0_11 = arith.constant 0 : index
    %c0_12 = arith.constant 0 : index
    %14 = vector.load %arg6[%c0_11, %c0_12] : memref<8x128xf32, #tpu.memory_space<vmem>>, vector<8x128xf32>
    tpu.vector_store %arg6[%c0_11, %c0_12], %13 {strides = array<i32>} : memref<8x128xf32, #tpu.memory_space<vmem>>, vector<8x128xf32>,
    return
  }
  func.func @transform_0(%arg0: i32) -> (i32, i32) {
    %c0_i32 = arith.constant 0 : i32
    %c0_i32_0 = arith.constant 0 : i32
    return %arg0, %c0_i32 : i32, i32
  }
  func.func @transform_1(%arg0: i32) -> (i32, i32) {
    %c0_i32 = arith.constant 0 : i32
    %c0_i32_0 = arith.constant 0 : i32
    %c0_i32_1 = arith.constant 0 : i32
    return %c0_i32, %c0_i32_0 : i32, i32
  }
  func.func @transform_2(%arg0: i32) -> (i32, i32) {
    %c0_i32 = arith.constant 0 : i32
    %c0_i32_0 = arith.constant 0 : i32
    %c0_i32_1 = arith.constant 0 : i32
    return %c0_i32, %c0_i32_0 : i32, i32
  }
  func.func @transform_3(%arg0: i32) -> (i32, i32) {
    %c0_i32 = arith.constant 0 : i32
    %c0_i32_0 = arith.constant 0 : i32
    %c0_i32_1 = arith.constant 0 : i32
    return %c0_i32, %c0_i32_0 : i32, i32
  }
  func.func @transform_4(%arg0: i32) -> (i32, i32) {
    %c0_i32 = arith.constant 0 : i32
    %c0_i32_0 = arith.constant 0 : i32
    %c0_i32_1 = arith.constant 0 : i32
    return %c0_i32, %c0_i32_0 : i32, i32
  }
  func.func @transform_5(%arg0: i32) -> (i32, i32) {
    %c0_i32 = arith.constant 0 : i32
    %c0_i32_0 = arith.constant 0 : i32
    return %arg0, %c0_i32 : i32, i32
  }
}

</mosaic_0001>

<bundles_post_ra>
// kernel: tpu_custom_call.1
= control target key start
LH: loop header
LB: loop body
LE: loop exit
PB: predicated region body
PF: predicated region fallthrough
CT: control target
= control target key end

     0   :  { %10 = vsyncpa [#allocation3], 0  ;;  %s5842_s0 = inlined_call_operand.vmem [shape: bf16[32,8], index: 0, kind: input, shape index: {}]   ;;  %s5843_s1 = inlined_call_operand.hbm [shape: bf16[8,4096], index: 1, kind: input, shape index: {}]   ;;  %s5844_s2 = inlined_call_operand.hbm [shape: f32[1,4096], index: 2, kind: input, shape index: {}]   ;;  %s5845_s3 = inlined_call_operand.hbm [shape: bf16[4096,128], index: 3, kind: input, shape index: {}]   ;;  %s5846_s4 = inlined_call_operand.vmem [shape: f32[1,128], index: 4, kind: input, shape index: {}]   ;;  %s5847_s5 = inlined_call_operand.hbm [shape: f32[32,128], index: 5, kind: output, shape index: {}]  }
   0x1   :  { %11 = vsyncpa [#allocation6], 0 }
   0x2   :  { %12 = vsyncpa [#allocation4], 0 }
   0x3   :  { %14 = vsyncpa [#allocation4 + $0x1], 0  ;;  %s5390_s18 = smov 0   ;;  %s5392_s19 = smov 0  }
   0x4   :  { %s5394_s20 = smov 0   ;;  %s5396_s21 = smov 0  }
   0x5 LB: > { %s5411_s22 = sadd.s32 4294967295, %s5351_s21   ;;  %s4147_s23 = sadd.s32 4294967294, %s5351_s21   ;;  %s5351_s21 = sphi %s5396_s21, %s5866_s21   ;;  %s5347_s20 = sphi %s5394_s20, %s5865_s20   ;;  %s5343_s19 = sphi %s5392_s19, %s5864_s19   ;;  %s5339_s18 = sphi %s5390_s18, %s5863_s18  }
   0x6   : > { %s5415_s24 = sadd.s32 1, %s5351_s21   ;;  %s137_s25 = sadd.s32 1, %s5347_s20 }
   0x7   : > { %s134_s26 = ssub.s32 %s5351_s21, %s5415_s24  ;;  %p147_p0 = scmp.ne.s32.totalorder %s5347_s20, %s5343_s19 }
   0x8   : > { %p135_p1 = scmp.eq.s32.totalorder %s134_s26, 0  ;;  %p148_p2 = scmp.eq.s32.totalorder %s5411_s22, 3 }
   0x9   : > { %p153_p3 = scmp.ne.s32.totalorder %s5343_s19, %s5339_s18  ;;  %p154_p4 = scmp.eq.s32.totalorder %s4147_s23, 3 }
   0xa   : > { %s5426_s27 = scalar_select %p135_p1, %s5347_s20, %s137_s25  }
   0xb   : > { %p5428_p5 = por %p148_p2, %p147_p0  ;;  %p5432_p6 = por %p154_p4, %p153_p3 }
   0xc   : > { %p4148_p7 = scmp.ge.s32.totalorder %s5351_s21, 1  ;;  %p161_p8 = scmp.lt.s32.totalorder %s5351_s21, 5 }
   0xd   : > { %s5851_s28 = scalar_select %p5428_p5, 1, 0 }
   0xe   : > { %s5852_s29 = scalar_select %p5432_p6, 1, 0 }
   0xf   : > { %p5848_p9 = scmp.eq.s32.totalorder %s5411_s22, 0  ;;  %p5439_p10 = pnand %p4148_p7, %p161_p8 }
  0x10   : > { %s5353_s6 = smov [#allocation5]   ;;  %s5354_s8 = smov [#allocation2]  }
  0x11   : > { %s5853_s30 = scalar_select %p5439_p10, 1, 0 }
  0x12   : > { %s185_s7 = sshll.u32 %s5353_s6, 4  ;;  %p4850_p11 = pneg %p5439_p10  ;;  %s186_s7 = int_to_ptr.vmem [resolvable:$true] %s185_s7 }
  0x13   : > { %s174_s9 = sshll.u32 %s5354_s8, 4  ;;  %s5355_s11 = smov [#allocation7]   ;;  %s5451_s9 = int_to_ptr.vmem [resolvable:$true] %s174_s9 }
  0x14   : > { %p5447_p12 = pnand %p5848_p9, %p4850_p11  ;;  %s195_s12 = sshll.u32 %s5355_s11, 4  ;;  %s5453_s12 = int_to_ptr.vmem [resolvable:$true] %s195_s12 }
  0x15   : > { %s5197_s15 = scalar_lea.hbm %s5844_s2, 512 }
  0x16   : > { %p5198_p13 = scmp.ne.s32.totalorder %s5844_s2, %s5197_s15  ;;  %p5463_p0 = pneg %p5447_p12 }
  0x17   : > { %p5204_p3 = scmp.lt.u32.totalorder %s5197_s15, %s5844_s2 }
  0x18   : > { %p5200_p1 = pnand %p5463_p0, %p5198_p13 }
  0x1a   : > { %p5201_p2 = pneg %p5200_p1 }
  0x1c   : > { %p5206_p4 = pnand %p5204_p3, %p5201_p2 }
  0x1e   : > { %5209 = shalt.err (!%p5206_p4)
}
  0x1f   : > { %s5210_s6 = scalar_lea.vmem %s186_s7, 512  ;;  %p5218_p9 = scmp.lt.s32.totalorder %s186_s7, %s186_s7 }
  0x20   : > { %p5211_p7 = scmp.ne.s32.totalorder %s186_s7, %s5210_s6  ;;  %p5219_p6 = scmp.lt.s32.totalorder %s5210_s6, %s5210_s6 }
  0x22   : > { %p5213_p8 = pnand %p5211_p7, %p5463_p0  ;;  %p5220_p5 = por %p5219_p6, %p5218_p9 }
  0x24   : > { %p5214_p11 = pneg %p5213_p8 }
  0x26   : > { %p5221_p10 = pnand %p5220_p5, %p5214_p11 }
  0x28   : > { %5224 = shalt.err (!%p5221_p10)
}
  0x29   : > { %4856 = dma.hbm_to_vmem [thread:$0]  (!%p5447_p12), %s5844_s2, 512, %s186_s7, [#allocation6]  }
  0x2a   : > { %s5225_s15 = scalar_lea.hbm %s5843_s1, 2048 }
  0x2b   : > { %p5226_p13 = scmp.ne.s32.totalorder %s5843_s1, %s5225_s15  ;;  %p5232_p5 = scmp.lt.u32.totalorder %s5225_s15, %s5843_s1 }
  0x2d   : > { %p5228_p1 = pnand %p5226_p13, %p5463_p0 }
  0x2f   : > { %p5229_p6 = pneg %p5228_p1 }
  0x31   : > { %p5234_p9 = pnand %p5232_p5, %p5229_p6 }
  0x33   : > { %5237 = shalt.err (!%p5234_p9)
}
  0x34   : > { %s5238_s7 = scalar_lea.vmem %s5451_s9, 2048  ;;  %p5246_p4 = scmp.lt.s32.totalorder %s5451_s9, %s5451_s9 }
  0x35   : > { %p5239_p10 = scmp.ne.s32.totalorder %s5451_s9, %s5238_s7  ;;  %p5247_p7 = scmp.lt.s32.totalorder %s5238_s7, %s5238_s7 }
  0x37   : > { %p5241_p2 = pnand %p5239_p10, %p5463_p0  ;;  %p5248_p8 = por %p5247_p7, %p5246_p4 }
  0x39   : > { %p5242_p3 = pneg %p5241_p2 }
  0x3b   : > { %p5249_p11 = pnand %p5248_p8, %p5242_p3 }
  0x3d   : > { %5252 = shalt.err (!%p5249_p11)
}
  0x3e   : > { %4853 = dma.hbm_to_vmem [thread:$0]  (!%p5447_p12), %s5843_s1, 2048, %s5451_s9, [#allocation3]  }
  0x3f   : > { %s5253_s14 = scalar_lea.hbm %s5845_s3, 32768 }
  0x40   : > { %p5254_p13 = scmp.ne.s32.totalorder %s5845_s3, %s5253_s14  ;;  %p5260_p5 = scmp.lt.u32.totalorder %s5253_s14, %s5845_s3 }
  0x42   : > { %p5256_p1 = pnand %p5254_p13, %p5463_p0 }
  0x44   : > { %p5257_p6 = pneg %p5256_p1 }
  0x46   : > { %p5262_p9 = pnand %p5260_p5, %p5257_p6 }
  0x48   : > { %5265 = shalt.err (!%p5262_p9)
}
  0x49   : > { %s5266_s9 = scalar_lea.vmem %s5453_s12, 32768  ;;  %p5274_p4 = scmp.lt.s32.totalorder %s5453_s12, %s5453_s12 }
  0x4a   : > { %p5267_p10 = scmp.ne.s32.totalorder %s5453_s12, %s5266_s9  ;;  %p5275_p7 = scmp.lt.s32.totalorder %s5266_s9, %s5266_s9 }
  0x4c   : > { %p5269_p2 = pnand %p5267_p10, %p5463_p0  ;;  %p5276_p8 = por %p5275_p7, %p5274_p4 }
  0x4e   : > { %p5270_p3 = pneg %p5269_p2 }
  0x50   : > { %p5277_p11 = pnand %p5276_p8, %p5270_p3 }
  0x52   : > { %5280 = shalt.err (!%p5277_p11)
}
  0x53   : > { %s5356_s26 = smov 64   ;;  %s5357_s7 = smov 4  }
  0x54   : > { %4859 = dma.hbm_to_vmem [thread:$0]  (!%p5447_p12), %s5845_s3, 32768, %s5453_s12, [#allocation6], %s5356_s26, %s5356_s26, %s5357_s7  }
  0x55   : > { %p5856_p13 = scmp.ne.s32.totalorder %s5853_s30, 0 }
  0x56   : > { %p5857_p0 = scmp.eq.s32.totalorder (!%p5856_p13), %s5411_s22, 0 }
  0x57   : > { %221 = sbr.rel (%p5856_p13) target bundleno = 782 (0x30e), region = 40 }
  0x5e   : > { %5326 = dma.done.wait (%p5857_p0), [#allocation3], 2048   ;;  %p5858_p1 = pmov %p5857_p0 }
  0x5f   : > { %p5859_p6 = pmov %p5857_p0 }
  0x60   : > { %5328 = vsyncadd (%p5858_p1), [#allocation3], 4294965248 }
  0x61   : > { %5330 = dma.done.wait (%p5859_p6), [#allocation6], 33280   ;;  %p5860_p5 = pmov %p5857_p0 }
  0x62   : > { %p256_p9 = scmp.lt.s32.totalorder %s5411_s22, 3  ;;  %v5358_v0 = vmov 0   ;;  %v262_v1 = vld [vmem:[#allocation2] sm:$0xff]  ;;  %vm530_vm0 = vcmask 1043456   ;;  %v263_v2 = vld [vmem:[#allocation2 + $0x8] sm:$0xff]  ;;  %v264_v7 = vld [vmem:[#allocation2 + $0x10] sm:$0xff] }
  0x63   : > { %5332 = vsyncadd (%p5860_p5), [#allocation6], 4294934016  ;;  %659 = vmatprep.mubr.bf16.mxu0 %v5358_v0  ;;  %700 = vmatprep.mubr.bf16.mxu1 %v5358_v0  ;;  %v4160_v3 = vcombine.high %v262_v1, %v262_v1  ;;  %v4162_v4 = vcombine.high %v263_v2, %v263_v2  ;;  %v4159_v5 = vcombine.low %v262_v1, %v262_v1  ;;  %v265_v8 = vld [vmem:[#allocation2 + $0x18] sm:$0xff]  ;;  %v266_v15 = vld [vmem:[#allocation2 + $0x20] sm:$0xff]  ;;  %vm526_vm1 = vcmask 64512   ;;  %s253_s15 = sand.u32 1, %s5343_s19  }
  0x64   : > { %s257_s30 = scalar_select %p256_p9, %s5411_s22, 3  ;;  %v4161_v6 = vcombine.low %v263_v2, %v263_v2  ;;  %v4164_v9 = vcombine.high %v264_v7, %v264_v7  ;;  %v4163_v10 = vcombine.low %v264_v7, %v264_v7  ;;  %v4166_v11 = vcombine.high %v265_v8, %v265_v8  ;;  %v267_v16 = vld [vmem:[#allocation2 + $0x28] sm:$0xff]  ;;  %v268_v24 = vld [vmem:[#allocation2 + $0x30] sm:$0xff]  ;;  %v269_v25 = vld [vmem:[#allocation2 + $0x38] sm:$0xff] }
  0x65   : > { %v4165_v12 = vcombine.low %v265_v8, %v265_v8  ;;  %4191 = vmatprep.subr.msk.bf16.mxu0 %vm530_vm0, %v4160_v3  ;;  %4193 = vmatprep.subr.msk.bf16.mxu1 %vm530_vm0, %v4162_v4  ;;  %v532_v13 = vsel %vm530_vm0, %v4159_v5, 0  ;;  %v4168_v20 = vcombine.high %v266_v15, %v266_v15  ;;  %v4170_v21 = vcombine.high %v267_v16, %v267_v16  ;;  %v270_v32 = vld [vmem:[#allocation2 + $0x40] sm:$0xff]  ;;  %v271_v33 = vld [vmem:[#allocation2 + $0x48] sm:$0xff]  ;;  %v272_v34 = vld [vmem:[#allocation2 + $0x50] sm:$0xff]  ;;  %s4157_s16 = sshll.u32 %s253_s15, 3  ;;  %s4481_s17 = sshll.u32 %s5411_s22, 7 }
  0x66   : > { %s4158_s10 = sshll.u32 %s257_s30, 2  ;;  %v538_v14 = vsel %vm530_vm0, %v4161_v6, 0  ;;  %628 = vmatpush1.bf16.msra.mxu0 %v532_v13  ;;  %v544_v18 = vsel %vm530_vm0, %v4163_v10, 0  ;;  %v4167_v22 = vcombine.low %v266_v15, %v266_v15  ;;  %v4169_v23 = vcombine.low %v267_v16, %v267_v16  ;;  %v273_v35 = vld [vmem:[#allocation2 + $0x58] sm:$0xff]  ;;  %v274_v36 = vld [vmem:[#allocation2 + $0x60] sm:$0xff]  ;;  %v275_v37 = vld [vmem:[#allocation2 + $0x68] sm:$0xff]  ;;  %s5800_s6 = scalar_lea.hbm %s5847_s5, %s4481_s17 }
  0x67   : > { %s259_s11 = scalar_lea.vmem %s5842_s0, %s4158_s10  ;;  %669 = vmatpush1.bf16.msra.mxu1 %v538_v14  ;;  %4195 = vmatprep.subr.msk.bf16.mxu0 %vm530_vm0, %v4164_v9  ;;  %v550_v19 = vsel %vm530_vm0, %v4165_v12, 0  ;;  %v4172_v28 = vcombine.high %v268_v24, %v268_v24  ;;  %v4174_v29 = vcombine.high %v269_v25, %v269_v25  ;;  %v4171_v30 = vcombine.low %v268_v24, %v268_v24  ;;  %v276_v42 = vld [vmem:[#allocation2 + $0x70] sm:$0xff]  ;;  %v277_v45 = vld [vmem:[#allocation2 + $0x78] sm:$0xff]  ;;  %v4941_v3 = vld [vmem:[#allocation7 + $0x40] sm:$0xff]   ;;  %s255_s25 = scalar_lea.vmem [#allocation8], %s4157_s16 }
  0x68   : > { %v5546_v17 = vld [vmem:[%s259_s11] sm:$0xf]  ;;  %4197 = vmatprep.subr.msk.bf16.mxu1 %vm530_vm0, %v4166_v11  ;;  %v556_v26 = vsel %vm530_vm0, %v4167_v22, 0  ;;  %v562_v27 = vsel %vm530_vm0, %v4169_v23, 0  ;;  %v4173_v31 = vcombine.low %v269_v25, %v269_v25  ;;  %v4176_v40 = vcombine.high %v270_v32, %v270_v32  ;;  %v4945_v7 = vld [vmem:[#allocation7 + $0x48] sm:$0xff]   ;;  %v4949_v11 = vld [vmem:[#allocation7 + $0x50] sm:$0xff]  }
  0x69   : > { %4192 = vmatmul.mubr.msk.bf16.vlgmr.msra.gmra.mrb[0].mxu0 %vm526_vm1, %v5546_v17  ;;  %v568_v38 = vsel %vm530_vm0, %v4171_v30, 0  ;;  %v4178_v41 = vcombine.high %v271_v33, %v271_v33  ;;  %v4175_v43 = vcombine.low %v270_v32, %v270_v32  ;;  %v4177_v44 = vcombine.low %v271_v33, %v271_v33  ;;  %v4942_v4 = vld [vmem:[#allocation7 + $0xc0] sm:$0xff]   ;;  %v4946_v8 = vld [vmem:[#allocation7 + $0xc8] sm:$0xff]   ;;  %v4950_v12 = vld [vmem:[#allocation7 + $0xd0] sm:$0xff]   ;;  %s4057_s9 = sshll.u32 %s255_s25, 4  ;;  %s4044_s8 = scalar_lea.sflag [#allocation4], %s253_s15  ;;  %s5802_s9 = int_to_ptr.vmem [resolvable:$true] %s4057_s9 }
  0x6a   : > { %4194 = vmatmul.mubr.msk.bf16.vlgmr.msra.gmra.mrb[0].mxu1 %vm526_vm1, %v5546_v17  ;;  %710 = vmatpush1.bf16.msra.mxu0 %v544_v18  ;;  %v574_v39 = vsel %vm530_vm0, %v4173_v31, 0  ;;  %v4179_v46 = vcombine.low %v272_v34, %v272_v34  ;;  %v4181_v47 = vcombine.low %v273_v35, %v273_v35  ;;  %v4183_v48 = vcombine.low %v274_v36, %v274_v36  ;;  %v4943_v5 = vld [vmem:[#allocation7] sm:$0xff]   ;;  %v4947_v9 = vld [vmem:[#allocation7 + $0x8] sm:$0xff]   ;;  %v4952_v13 = vld [vmem:[#allocation7 + $0x90] sm:$0xff]   ;;  %s5281_s30 = scalar_lea.vmem %s5802_s9, 128  ;;  %p5861_p10 = scmp.ne.s32.totalorder %s5851_s28, 0 }
  0x6b   : > { %751 = vmatpush1.bf16.msra.mxu1 %v550_v19  ;;  %741 = vmatprep.mubr.bf16.mxu0 %v5358_v0  ;;  %v4185_v49 = vcombine.low %v275_v37, %v275_v37  ;;  %v4187_v50 = vcombine.low %v276_v42, %v276_v42  ;;  %v4189_v51 = vcombine.low %v277_v45, %v277_v45  ;;  %v580_v52 = vsel %vm530_vm0, %v4175_v43, 0  ;;  %v4944_v6 = vld [vmem:[#allocation7 + $0x80] sm:$0xff]   ;;  %v4948_v10 = vld [vmem:[#allocation7 + $0x88] sm:$0xff]   ;;  %v4953_v14 = vld [vmem:[#allocation7 + $0x58] sm:$0xff]   ;;  %p5282_p12 = scmp.ne.s32.totalorder %s5802_s9, %s5281_s30  ;;  %s5359_s22 = smov [#allocation8]  }
  0x6c   : > { %782 = vmatprep.mubr.bf16.mxu1 %v5358_v0  ;;  %4199 = vmatprep.subr.msk.bf16.mxu0 %vm530_vm0, %v4168_v20  ;;  %v586_v53 = vsel %vm530_vm0, %v4177_v44, 0  ;;  %v592_v54 = vsel %vm530_vm0, %v4179_v46, 0  ;;  %v598_v55 = vsel %vm530_vm0, %v4181_v47, 0  ;;  %v604_v56 = vsel %vm530_vm0, %v4183_v48, 0  ;;  %v4954_v15 = vld [vmem:[#allocation7 + $0xd8] sm:$0xff]   ;;  %v4957_v19 = vld [vmem:[#allocation7 + $0x60] sm:$0xff]  }
  0x6d   : > { %4201 = vmatprep.subr.msk.bf16.mxu1 %vm530_vm0, %v4170_v21  ;;  %v610_v57 = vsel %vm530_vm0, %v4185_v49, 0  ;;  %v4180_v58 = vcombine.high %v272_v34, %v272_v34  ;;  %v4182_v59 = vcombine.high %v273_v35, %v273_v35  ;;  %v616_v60 = vsel %vm530_vm0, %v4187_v50, 0  ;;  %v4955_v16 = vld [vmem:[#allocation7 + $0x18] sm:$0xff]   ;;  %v4958_v20 = vld [vmem:[#allocation7 + $0xe0] sm:$0xff]   ;;  %v4961_v22 = vld [vmem:[#allocation7 + $0x68] sm:$0xff]   ;;  %p5283_p2 = pnand %p5282_p12, %p5861_p10  ;;  %s5285_s10 = sshll.u32 %s5359_s22, 4  ;;  %s5286_s10 = int_to_ptr.vmem [resolvable:$false] %s5285_s10 }
  0x6e   : > { %v622_v61 = vsel %vm530_vm0, %v4189_v51, 0  ;;  %v4184_v62 = vcombine.high %v274_v36, %v274_v36  ;;  %v4186_v63 = vcombine.high %v275_v37, %v275_v37  ;;  %v4188_v1 = vcombine.high %v276_v42, %v276_v42  ;;  %v4956_v18 = vld [vmem:[#allocation7 + $0x98] sm:$0xff]   ;;  %v4960_v21 = vld [vmem:[#allocation7 + $0xa0] sm:$0xff]   ;;  %v4962_v23 = vld [vmem:[#allocation7 + $0xe8] sm:$0xff]   ;;  %s5287_s12 = scalar_lea.vmem %s5286_s10, 256  ;;  %p5288_p4 = scmp.lt.s32.totalorder %s5802_s9, %s5286_s10 }
  0x6f   : > { %v4190_v2 = vcombine.high %v277_v45, %v277_v45  ;;  %v4963_v24 = vld [vmem:[#allocation7 + $0x28] sm:$0xff]   ;;  %v4969_v30 = vld [vmem:[#allocation7 + $0x78] sm:$0xff]   ;;  %v4973_v34 = vld [vmem:[#allocation7 + $0x140] sm:$0xff]   ;;  %v286_v36 = vlaneseq  ;;  %p5284_p3 = pneg %p5283_p2  ;;  %p5289_p7 = scmp.lt.s32.totalorder %s5287_s12, %s5281_s30 }
  0x70   : > { %v4964_v25 = vld [vmem:[#allocation7 + $0xa8] sm:$0xff]   ;;  %v4970_v31 = vld [vmem:[#allocation7 + $0xf8] sm:$0xff]   ;;  %v4974_v35 = vld [vmem:[#allocation7 + $0x1c0] sm:$0xff]  }
  0x71   : > { %4196 = vmatmul.mubr.msk.bf16.vlgmr.msra.gmra.mrb[4].mxu0 %vm526_vm1, %v5546_v17  ;;  %v4971_v32 = vld [vmem:[#allocation7 + $0x38] sm:$0xff]   ;;  %v5622_v37 = vshrl.u32 %v286_v36, 7  ;;  %p5290_p8 = por %p5289_p7, %p5288_p4 }
  0x72   : > { %4198 = vmatmul.mubr.msk.bf16.vlgmr.msra.gmra.mrb[4].mxu1 %vm526_vm1, %v5546_v17  ;;  %792 = vmatpush1.bf16.msra.mxu0 %v556_v26  ;;  %v4965_v26 = vld [vmem:[#allocation7 + $0x70] sm:$0xff]   ;;  %v4972_v33 = vld [vmem:[#allocation7 + $0xb8] sm:$0xff]  }
  0x73   : > { %833 = vmatpush1.bf16.msra.mxu1 %v562_v27  ;;  %823 = vmatprep.mubr.bf16.mxu0 %v5358_v0  ;;  %v4966_v27 = vld [vmem:[#allocation7 + $0xf0] sm:$0xff]   ;;  %v5636_v42 = vsub.s32 3, %v5622_v37  ;;  %p5291_p11 = pnand %p5290_p8, %p5284_p3 }
  0x74   : > { %864 = vmatprep.mubr.bf16.mxu1 %v5358_v0  ;;  %4203 = vmatprep.subr.msk.bf16.mxu0 %vm530_vm0, %v4172_v28  ;;  %v4967_v28 = vld [vmem:[#allocation7 + $0x30] sm:$0xff]  }
  0x75   : > { %4205 = vmatprep.subr.msk.bf16.mxu1 %vm530_vm0, %v4174_v29  ;;  %v4968_v29 = vld [vmem:[#allocation7 + $0xb0] sm:$0xff]  }
  0x79   : > { %4200 = vmatmul.mubr.msk.bf16.vlgmr.msra.gmra.mrb[8].mxu0 %vm526_vm1, %v5546_v17 }
  0x7a   : > { %4202 = vmatmul.mubr.msk.bf16.vlgmr.msra.gmra.mrb[8].mxu1 %vm526_vm1, %v5546_v17  ;;  %874 = vmatpush1.bf16.msra.mxu0 %v568_v38  ;;  %v5625_v38 = vsub.s32 0, %v5622_v37 }
  0x7b   : > { %915 = vmatpush1.bf16.msra.mxu1 %v574_v39  ;;  %905 = vmatprep.mubr.bf16.mxu0 %v5358_v0  ;;  %v5627_v39 = vld [vmem:[#allocation5] sm:$0xff] }
  0x7c   : > { %946 = vmatprep.mubr.bf16.mxu1 %v5358_v0  ;;  %4207 = vmatprep.subr.msk.bf16.mxu0 %vm530_vm0, %v4176_v40  ;;  %v5630_v40 = vsub.s32 2, %v5622_v37  ;;  %v289_v43 = vrot.slane %v5627_v39, %v5625_v38  ;;  %v301_v46 = vrot.slane %v5627_v39, %v5636_v42 }
  0x7d   : > { %4209 = vmatprep.subr.msk.bf16.mxu1 %vm530_vm0, %v4178_v41  ;;  %v5633_v41 = vsub.s32 1, %v5622_v37 }
  0x7e   : > { %v297_v44 = vrot.slane %v5627_v39, %v5630_v40 }
  0x7f   : > { %v293_v45 = vrot.slane %v5627_v39, %v5633_v41 }
  0x81   : > { %4204 = vmatmul.mubr.msk.bf16.vlgmr.msra.gmra.mrb[12].mxu0 %vm526_vm1, %v5546_v17 }
  0x82   : > { %4206 = vmatmul.mubr.msk.bf16.vlgmr.msra.gmra.mrb[12].mxu1 %vm526_vm1, %v5546_v17  ;;  %956 = vmatpush1.bf16.msra.mxu0 %v580_v52 }
  0x83   : > { %997 = vmatpush1.bf16.msra.mxu1 %v586_v53  ;;  %987 = vmatprep.mubr.bf16.mxu0 %v5358_v0 }
  0x84   : > { %1028 = vmatprep.mubr.bf16.mxu1 %v5358_v0  ;;  %4211 = vmatprep.subr.msk.bf16.mxu0 %vm530_vm0, %v4180_v58  ;;  %v5650_v58 = vsub.s32 7, %v5622_v37 }
  0x85   : > { %4213 = vmatprep.subr.msk.bf16.mxu1 %vm530_vm0, %v4182_v59 }
  0x89   : > { %4208 = vmatmul.mubr.msk.bf16.vlgmr.msra.gmra.mrb[16].mxu0 %vm526_vm1, %v5546_v17 }
  0x8a   : > { %4210 = vmatmul.mubr.msk.bf16.vlgmr.msra.gmra.mrb[16].mxu1 %vm526_vm1, %v5546_v17  ;;  %1038 = vmatpush1.bf16.msra.mxu0 %v592_v54 }
  0x8b   : > { %1079 = vmatpush1.bf16.msra.mxu1 %v598_v55  ;;  %1069 = vmatprep.mubr.bf16.mxu0 %v5358_v0 }
  0x8c   : > { %1110 = vmatprep.mubr.bf16.mxu1 %v5358_v0  ;;  %4215 = vmatprep.subr.msk.bf16.mxu0 %vm530_vm0, %v4184_v62 }
  0x8d   : > { %4217 = vmatprep.subr.msk.bf16.mxu1 %vm530_vm0, %v4186_v63 }
  0x91   : > { %4212 = vmatmul.mubr.msk.bf16.vlgmr.msra.gmra.mrb[20].mxu0 %vm526_vm1, %v5546_v17 }
  0x92   : > { %4214 = vmatmul.mubr.msk.bf16.vlgmr.msra.gmra.mrb[20].mxu1 %vm526_vm1, %v5546_v17  ;;  %1120 = vmatpush1.bf16.msra.mxu0 %v604_v56 }
  0x93   : > { %1161 = vmatpush1.bf16.msra.mxu1 %v610_v57  ;;  %1151 = vmatprep.mubr.bf16.mxu0 %v5358_v0  ;;  %v5647_v57 = vsub.s32 5, %v5622_v37 }
  0x94   : > { %1192 = vmatprep.mubr.bf16.mxu1 %v5358_v0  ;;  %4219 = vmatprep.subr.msk.bf16.mxu0 %vm530_vm0, %v4188_v1 }
  0x95   : > { %4221 = vmatprep.subr.msk.bf16.mxu1 %vm530_vm0, %v4190_v2  ;;  %v4975_v2 = vld [vmem:[#allocation7 + $0x100] sm:$0xff]  }
  0x99   : > { %4216 = vmatmul.mubr.msk.bf16.vlgmr.msra.gmra.mrb[24].mxu0 %vm526_vm1, %v5546_v17 }
  0x9a   : > { %4218 = vmatmul.mubr.msk.bf16.vlgmr.msra.gmra.mrb[24].mxu1 %vm526_vm1, %v5546_v17  ;;  %1202 = vmatpush1.bf16.msra.mxu0 %v616_v60 }
  0x9b   : > { %1243 = vmatpush1.bf16.msra.mxu1 %v622_v61  ;;  %1233 = vmatprep.mubr.bf16.mxu0 %v5358_v0 }
  0x9c   : > { %1274 = vmatprep.mubr.bf16.mxu1 %v5358_v0  ;;  %4484 = vmatprep.subr.bf16.mxu0 %v4941_v3  ;;  %v4951_v0 = vld [vmem:[#allocation7 + $0x10] sm:$0xff]   ;;  %v4976_v3 = vld [vmem:[#allocation7 + $0x180] sm:$0xff]  }
  0x9d   : > { %4506 = vmatprep.subr.bf16.mxu1 %v4942_v4 }
  0xa1   : > { %4220 = vmatmul.mubr.msk.bf16.vlgmr.msra.gmra.mrb[28].mxu0 %vm526_vm1, %v5546_v17 }
  0xa2   : > { %4222 = vmatmul.mubr.msk.bf16.vlgmr.msra.gmra.mrb[28].mxu1 %vm526_vm1, %v5546_v17  ;;  %4485 = vmatpush3.bf16.msra.mxu0 %v4943_v5  ;;  %v4959_v17 = vld [vmem:[#allocation7 + $0x20] sm:$0xff]  }
  0xa3   : > { %4507 = vmatpush3.bf16.msra.mxu1 %v4944_v6  ;;  %4486 = vmatprep.subr.bf16.mxu0 %v4945_v7  ;;  %v309_v7 = vrot.slane %v5627_v39, %v5647_v57 }
  0xa4   : > { %4508 = vmatprep.subr.bf16.mxu1 %v4946_v8  ;;  %v317_v8 = vrot.slane %v5627_v39, %v5650_v58 }
  0xa6   : > { %4487 = vmatpush3.bf16.msra.mxu0 %v4947_v9 }
  0xa7   : > { %4509 = vmatpush3.bf16.msra.mxu1 %v4948_v10  ;;  %4488 = vmatprep.subr.bf16.mxu0 %v4949_v11  ;;  %v4977_v10 = vld [vmem:[#allocation7 + $0x148] sm:$0xff]  }
  0xa8   : > { %4510 = vmatprep.subr.bf16.mxu1 %v4950_v12  ;;  %v4978_v11 = vld [vmem:[#allocation7 + $0x1c8] sm:$0xff]  }
  0xaa   : > { %4489 = vmatpush3.bf16.msra.mxu0 %v4951_v0 }
  0xab   : > { %4511 = vmatpush3.bf16.msra.mxu1 %v4952_v13  ;;  %4490 = vmatprep.subr.bf16.mxu0 %v4953_v14 }
  0xac   : > { %4512 = vmatprep.subr.bf16.mxu1 %v4954_v15  ;;  %v4979_v15 = vld [vmem:[#allocation7 + $0x108] sm:$0xff]  }
  0xae   : > { %4491 = vmatpush3.bf16.msra.mxu0 %v4955_v16  ;;  %v4980_v16 = vld [vmem:[#allocation7 + $0x188] sm:$0xff]  }
  0xaf   : > { %4513 = vmatpush3.bf16.msra.mxu1 %v4956_v18  ;;  %4492 = vmatprep.subr.bf16.mxu0 %v4957_v19 }
  0xb0   : > { %4514 = vmatprep.subr.bf16.mxu1 %v4958_v20 }
  0xb2   : > { %4493 = vmatpush3.bf16.msra.mxu0 %v4959_v17 }
  0xb3   : > { %4515 = vmatpush3.bf16.msra.mxu1 %v4960_v21  ;;  %4494 = vmatprep.subr.bf16.mxu0 %v4961_v22  ;;  %v4981_v21 = vld [vmem:[#allocation7 + $0x150] sm:$0xff]  }
  0xb4   : > { %4516 = vmatprep.subr.bf16.mxu1 %v4962_v23  ;;  %v4982_v22 = vld [vmem:[#allocation7 + $0x1d0] sm:$0xff]  }
  0xb6   : > { %4495 = vmatpush3.bf16.msra.mxu0 %v4963_v24 }
  0xb7   : > { %4517 = vmatpush3.bf16.msra.mxu1 %v4964_v25  ;;  %4496 = vmatprep.subr.bf16.mxu0 %v4965_v26  ;;  %v4983_v25 = vld [vmem:[#allocation7 + $0x110] sm:$0xff]  }
  0xb8   : > { %4518 = vmatprep.subr.bf16.mxu1 %v4966_v27 }
  0xba   : > { %4497 = vmatpush3.bf16.msra.mxu0 %v4967_v28  ;;  %v4984_v28 = vld [vmem:[#allocation7 + $0x190] sm:$0xff]  }
  0xbb   : > { %4519 = vmatpush3.bf16.msra.mxu1 %v4968_v29  ;;  %4498 = vmatprep.subr.bf16.mxu0 %v4969_v30 }
  0xbc   : > { %4520 = vmatprep.subr.bf16.mxu1 %v4970_v31  ;;  %v4985_v31 = vld [vmem:[#allocation7 + $0x158] sm:$0xff]  }
  0xbe   : > { %4499 = vmatpush3.bf16.msra.mxu0 %v4971_v32  ;;  %v4986_v32 = vld [vmem:[#allocation7 + $0x1d8] sm:$0xff]  }
  0xbf   : > { %4521 = vmatpush3.bf16.msra.mxu1 %v4972_v33  ;;  %4528 = vmatprep.subr.bf16.mxu0 %v4973_v34 }
  0xc0   : > { %4550 = vmatprep.subr.bf16.mxu1 %v4974_v35 }
 0x13c   : > { %v661_v47 = vpop.f32.mrb[0].mxu0 }
 0x13d   : > { %v702_v48 = vpop.f32.mrb[0].mxu1  ;;  %v662_v49 = vadd.f32 %v661_v47, %v289_v43  ;;  %v663_v51 = vpop.f32.mrb[1].mxu0  ;;  %v4987_v43 = vld [vmem:[#allocation7 + $0x118] sm:$0xff]   ;;  %v4989_v47 = vld [vmem:[#allocation7 + $0x160] sm:$0xff]  }
 0x13e   : > { %v703_v50 = vadd.f32 %v702_v48, %v297_v44  ;;  %v704_v52 = vpop.f32.mrb[1].mxu1  ;;  %v664_v53 = vadd.f32 %v663_v51, %v293_v45  ;;  %v665_v55 = vpop.f32.mrb[2].mxu0  ;;  %v4988_v44 = vld [vmem:[#allocation7 + $0x198] sm:$0xff]   ;;  %v4990_v48 = vld [vmem:[#allocation7 + $0x1e0] sm:$0xff]  }
 0x13f   : > { %v705_v54 = vadd.f32 %v704_v52, %v301_v46  ;;  %v706_v56 = vpop.f32.mrb[2].mxu1  ;;  %v1283_v59 = vmax.f32 %v662_v49, 0.0  ;;  %v666_v61 = vpop.f32.mrb[3].mxu0  ;;  %v4991_v51 = vld [vmem:[#allocation7 + $0x120] sm:$0xff]   ;;  %v5665_v52 = vsub.s32 4, %v5622_v37  ;;  %v4993_v55 = vld [vmem:[#allocation7 + $0x168] sm:$0xff]  }
 0x140   : > { %v1285_v60 = vmax.f32 %v703_v50, 0.0  ;;  %v707_v62 = vpop.f32.mrb[3].mxu1  ;;  %v1284_v63 = vmax.f32 %v664_v53, 0.0  ;;  %v5668_v53 = vsub.s32 6, %v5622_v37  ;;  %v4994_v56 = vld [vmem:[#allocation7 + $0x1e8] sm:$0xff]  }
 0x141   : > { %v1286_v1 = vmax.f32 %v705_v54, 0.0  ;;  %v1315_v9 = vpack.c.bf16 %v1283_v59, %v1283_v59  ;;  %v4992_v54 = vld [vmem:[#allocation7 + $0x1a0] sm:$0xff]   ;;  %v305_v61 = vrot.slane %v5627_v39, %v5665_v52 }
 0x142   : > { %v1317_v4 = vpack.c.bf16 %v1285_v60, %v1285_v60  ;;  %v1316_v5 = vpack.c.bf16 %v1284_v63, %v1284_v63  ;;  %v313_v62 = vrot.slane %v5627_v39, %v5668_v53  ;;  %v5678_v63 = vld [vmem:[#allocation5 + $0x8] sm:$0xff] }
 0x143   : > { %v1318_v6 = vpack.c.bf16 %v1286_v1, %v1286_v1  ;;  %v325_v39 = vrot.slane %v5678_v63, %v5633_v41 }
 0x144   : > { %3434 = vmatprep.mubr.bf16.mxu0 %v1316_v5  ;;  %v5656_v12 = vpop.f32.mrb[4].mxu0 }
 0x145   : > { %3474 = vmatprep.mubr.bf16.mxu1 %v1318_v6  ;;  %v5658_v0 = vpop.f32.mrb[4].mxu1  ;;  %3435 = vmatmul.mubr.bf16.vlgmr.msra.gmra.mrb[32].mxu0 %v1315_v9  ;;  %v745_v13 = vpop.f32.mrb[5].mxu0  ;;  %v4997_v6 = vld [vmem:[#allocation7 + $0x170] sm:$0xff]  }
 0x146   : > { %3475 = vmatmul.mubr.bf16.vlgmr.msra.gmra.mrb[32].mxu1 %v1317_v4  ;;  %v786_v14 = vpop.f32.mrb[5].mxu1  ;;  %4529 = vmatpush3.bf16.msra.mxu0 %v4975_v2  ;;  %v746_v18 = vadd.f32 %v745_v13, %v309_v7  ;;  %v747_v19 = vpop.f32.mrb[6].mxu0  ;;  %v4995_v2 = vld [vmem:[#allocation7 + $0x128] sm:$0xff]   ;;  %v4998_v7 = vld [vmem:[#allocation7 + $0x1f0] sm:$0xff]   ;;  %v785_v13 = vadd.f32 %v5658_v0, %v313_v62  ;;  %v5003_v0 = vld [vmem:[#allocation7 + $0x138] sm:$0xff]  }
 0x147   : > { %4551 = vmatpush3.bf16.msra.mxu1 %v4976_v3  ;;  %v787_v20 = vadd.f32 %v786_v14, %v317_v8  ;;  %v788_v17 = vpop.f32.mrb[6].mxu1  ;;  %4530 = vmatprep.subr.bf16.mxu0 %v4977_v10  ;;  %v748_v23 = vpop.f32.mrb[7].mxu0  ;;  %v4996_v3 = vld [vmem:[#allocation7 + $0x1a8] sm:$0xff]   ;;  %v333_v10 = vrot.slane %v5678_v63, %v5636_v42  ;;  %v4999_v14 = vld [vmem:[#allocation7 + $0x130] sm:$0xff]  }
 0x148   : > { %4552 = vmatprep.subr.bf16.mxu1 %v4978_v11  ;;  %v789_v24 = vpop.f32.mrb[7].mxu1  ;;  %v1288_v26 = vmax.f32 %v746_v18, 0.0  ;;  %v744_v11 = vadd.f32 %v5656_v12, %v305_v61  ;;  %v5002_v18 = vld [vmem:[#allocation7 + $0x1f8] sm:$0xff]   ;;  %v1289_v23 = vmax.f32 %v785_v13, 0.0  ;;  %v5012_v61 = vld [vmem:[#allocation7 + $0x288] sm:$0xff]  }
 0x149   : > { %v1290_v27 = vmax.f32 %v787_v20, 0.0  ;;  %v5020_v13 = vld [vmem:[#allocation7 + $0x298] sm:$0xff]  }
 0x14a   : > { %4531 = vmatpush3.bf16.msra.mxu0 %v4979_v15  ;;  %v1320_v29 = vpack.c.bf16 %v1288_v26, %v1288_v26  ;;  %v5000_v15 = vld [vmem:[#allocation7 + $0x1b0] sm:$0xff]  }
 0x14b   : > { %4553 = vmatpush3.bf16.msra.mxu1 %v4980_v16  ;;  %v1322_v30 = vpack.c.bf16 %v1290_v27, %v1290_v27  ;;  %4532 = vmatprep.subr.bf16.mxu0 %v4981_v21  ;;  %v5001_v16 = vld [vmem:[#allocation7 + $0x178] sm:$0xff]  }
 0x14c   : > { %4554 = vmatprep.subr.bf16.mxu1 %v4982_v22  ;;  %3514 = vmatprep.mubr.bf16.mxu0 %v1320_v29  ;;  %v5660_v33 = vpop.f32.mrb[8].mxu0  ;;  %v1287_v22 = vmax.f32 %v744_v11, 0.0  ;;  %v5006_v29 = vld [vmem:[#allocation7 + $0x2c0] sm:$0xff]   ;;  %v5019_v11 = vld [vmem:[#allocation7 + $0x218] sm:$0xff]  }
 0x14d   : > { %3554 = vmatprep.mubr.bf16.mxu1 %v1322_v30  ;;  %v5662_v34 = vpop.f32.mrb[8].mxu1  ;;  %v827_v35 = vpop.f32.mrb[9].mxu0 }
 0x14e   : > { %v868_v36 = vpop.f32.mrb[9].mxu1  ;;  %4533 = vmatpush3.bf16.msra.mxu0 %v4983_v25  ;;  %v829_v45 = vpop.f32.mrb[10].mxu0  ;;  %v828_v19 = vadd.f32 %v827_v35, %v325_v39  ;;  %v5004_v25 = vld [vmem:[#allocation7 + $0x1b8] sm:$0xff]  }
 0x14f   : > { %4555 = vmatpush3.bf16.msra.mxu1 %v4984_v28  ;;  %v870_v46 = vpop.f32.mrb[10].mxu1  ;;  %4534 = vmatprep.subr.bf16.mxu0 %v4985_v31  ;;  %v830_v49 = vpop.f32.mrb[11].mxu0  ;;  %v869_v20 = vadd.f32 %v868_v36, %v333_v10  ;;  %v5005_v28 = vld [vmem:[#allocation7 + $0x240] sm:$0xff]   ;;  %v1319_v36 = vpack.c.bf16 %v1287_v22, %v1287_v22  ;;  %v5018_v39 = vld [vmem:[#allocation7 + $0x2d8] sm:$0xff]  }
 0x150   : > { %4556 = vmatprep.subr.bf16.mxu1 %v4986_v32  ;;  %v871_v50 = vpop.f32.mrb[11].mxu1  ;;  %v1292_v32 = vmax.f32 %v828_v19, 0.0  ;;  %v5008_v45 = vld [vmem:[#allocation7 + $0x280] sm:$0xff]   ;;  %v5009_v46 = vld [vmem:[#allocation7 + $0x248] sm:$0xff]  }
 0x151   : > { %v1294_v35 = vmax.f32 %v869_v20, 0.0 }
 0x152   : > { %4535 = vmatpush3.bf16.msra.mxu0 %v4987_v43  ;;  %v1321_v43 = vpack.c.bf16 %v1289_v23, %v1289_v23 }
 0x153   : > { %4557 = vmatpush3.bf16.msra.mxu1 %v4988_v44  ;;  %4536 = vmatprep.subr.bf16.mxu0 %v4989_v47  ;;  %v5007_v44 = vld [vmem:[#allocation7 + $0x200] sm:$0xff]   ;;  %v5010_v47 = vld [vmem:[#allocation7 + $0x2c8] sm:$0xff]   ;;  %v1326_v49 = vpack.c.bf16 %v1294_v35, %v1294_v35 }
 0x154   : > { %4558 = vmatprep.subr.bf16.mxu1 %v4990_v48  ;;  %v5670_v59 = vpop.f32.mrb[12].mxu0  ;;  %v1324_v48 = vpack.c.bf16 %v1292_v32, %v1292_v32  ;;  %v5027_v32 = vld [vmem:[#allocation7 + $0x228] sm:$0xff]  }
 0x155   : > { %v5672_v60 = vpop.f32.mrb[12].mxu1  ;;  %v5680_v37 = vpop.f32.mrb[13].mxu0  ;;  %v5028_v35 = vld [vmem:[#allocation7 + $0x2a8] sm:$0xff]  }
 0x156   : > { %v5682_v1 = vpop.f32.mrb[13].mxu1  ;;  %4537 = vmatpush3.bf16.msra.mxu0 %v4991_v51  ;;  %v911_v4 = vpop.f32.mrb[14].mxu0 }
 0x157   : > { %4559 = vmatpush3.bf16.msra.mxu1 %v4992_v54  ;;  %v952_v5 = vpop.f32.mrb[14].mxu1  ;;  %4538 = vmatprep.subr.bf16.mxu0 %v4993_v55  ;;  %v912_v8 = vpop.f32.mrb[15].mxu0  ;;  %v5014_v4 = vld [vmem:[#allocation7 + $0x2d0] sm:$0xff]  }
 0x158   : > { %4560 = vmatprep.subr.bf16.mxu1 %v4994_v56  ;;  %v953_v9 = vpop.f32.mrb[15].mxu1  ;;  %v5011_v56 = vld [vmem:[#allocation7 + $0x208] sm:$0xff]   ;;  %v5016_v8 = vld [vmem:[#allocation7 + $0x290] sm:$0xff]  }
 0x159   : > { %v5017_v9 = vld [vmem:[#allocation7 + $0x258] sm:$0xff]  }
 0x15a   : > { %4539 = vmatpush3.bf16.msra.mxu0 %v4995_v2 }
 0x15b   : > { %4561 = vmatpush3.bf16.msra.mxu1 %v4996_v3  ;;  %4540 = vmatprep.subr.bf16.mxu0 %v4997_v6  ;;  %v5013_v3 = vld [vmem:[#allocation7 + $0x250] sm:$0xff]  }
 0x15c   : > { %4562 = vmatprep.subr.bf16.mxu1 %v4998_v7  ;;  %v5690_v17 = vpop.f32.mrb[16].mxu0  ;;  %v5015_v7 = vld [vmem:[#allocation7 + $0x210] sm:$0xff]  }
 0x15d   : > { %v5692_v21 = vpop.f32.mrb[16].mxu1  ;;  %v5694_v24 = vpop.f32.mrb[17].mxu0 }
 0x15e   : > { %v5696_v12 = vpop.f32.mrb[17].mxu1  ;;  %4541 = vmatpush3.bf16.msra.mxu0 %v4999_v14  ;;  %v993_v26 = vpop.f32.mrb[18].mxu0 }
 0x15f   : > { %4563 = vmatpush3.bf16.msra.mxu1 %v5000_v15  ;;  %v1034_v27 = vpop.f32.mrb[18].mxu1  ;;  %4542 = vmatprep.subr.bf16.mxu0 %v5001_v16  ;;  %v994_v30 = vpop.f32.mrb[19].mxu0  ;;  %v5021_v16 = vld [vmem:[#allocation7 + $0x260] sm:$0xff]  }
 0x160   : > { %4564 = vmatprep.subr.bf16.mxu1 %v5002_v18  ;;  %v1035_v31 = vpop.f32.mrb[19].mxu1  ;;  %v5022_v18 = vld [vmem:[#allocation7 + $0x2e0] sm:$0xff]   ;;  %v5025_v27 = vld [vmem:[#allocation7 + $0x268] sm:$0xff]   ;;  %v321_v30 = vrot.slane %v5678_v63, %v5625_v38 }
 0x161   : > { %v5024_v26 = vld [vmem:[#allocation7 + $0x2a0] sm:$0xff]   ;;  %v329_v31 = vrot.slane %v5678_v63, %v5630_v40 }
 0x162   : > { %4543 = vmatpush3.bf16.msra.mxu0 %v5003_v0 }
 0x163   : > { %4565 = vmatpush3.bf16.msra.mxu1 %v5004_v25  ;;  %4572 = vmatprep.subr.bf16.mxu0 %v5005_v28  ;;  %v5023_v25 = vld [vmem:[#allocation7 + $0x220] sm:$0xff]   ;;  %v5026_v28 = vld [vmem:[#allocation7 + $0x2e8] sm:$0xff]  }
 0x164   : > { %4594 = vmatprep.subr.bf16.mxu1 %v5006_v29  ;;  %v5698_v50 = vpop.f32.mrb[20].mxu0 }
 0x165   : > { %v5700_v51 = vpop.f32.mrb[20].mxu1  ;;  %3515 = vmatmul.mubr.bf16.vlgmr.msra.gmra.mrb[36].mxu0 %v1319_v36  ;;  %v5702_v54 = vpop.f32.mrb[21].mxu0 }
 0x166   : > { %3555 = vmatmul.mubr.bf16.vlgmr.msra.gmra.mrb[36].mxu1 %v1321_v43  ;;  %v5704_v55 = vpop.f32.mrb[21].mxu1  ;;  %4573 = vmatpush3.bf16.msra.mxu0 %v5007_v44  ;;  %v1075_v62 = vpop.f32.mrb[22].mxu0  ;;  %v5029_v44 = vld [vmem:[#allocation7 + $0x270] sm:$0xff]  }
 0x167   : > { %4595 = vmatpush3.bf16.msra.mxu1 %v5008_v45  ;;  %v1116_v2 = vpop.f32.mrb[22].mxu1  ;;  %4574 = vmatprep.subr.bf16.mxu0 %v5009_v46  ;;  %v1076_v5 = vpop.f32.mrb[23].mxu0  ;;  %v5030_v45 = vld [vmem:[#allocation7 + $0x2f0] sm:$0xff]   ;;  %v826_v62 = vadd.f32 %v5660_v33, %v321_v30  ;;  %v5035_v33 = vld [vmem:[#allocation7 + $0x238] sm:$0xff]   ;;  %v5044_v30 = vld [vmem:[#allocation7 + $0x388] sm:$0xff]  }
 0x168   : > { %4596 = vmatprep.subr.bf16.mxu1 %v5010_v47  ;;  %v1117_v6 = vpop.f32.mrb[23].mxu1  ;;  %3594 = vmatprep.mubr.bf16.mxu0 %v1324_v48  ;;  %v341_v48 = vrot.slane %v5678_v63, %v5647_v57  ;;  %v867_v2 = vadd.f32 %v5662_v34, %v329_v31  ;;  %v5032_v5 = vld [vmem:[#allocation7 + $0x2b0] sm:$0xff]   ;;  %v5037_v34 = vld [vmem:[#allocation7 + $0x340] sm:$0xff]  }
 0x169   : > { %3634 = vmatprep.mubr.bf16.mxu1 %v1326_v49  ;;  %v349_v49 = vrot.slane %v5678_v63, %v5650_v58  ;;  %v5033_v6 = vld [vmem:[#allocation7 + $0x278] sm:$0xff]   ;;  %v5045_v31 = vld [vmem:[#allocation7 + $0x350] sm:$0xff]  }
 0x16a   : > { %4575 = vmatpush3.bf16.msra.mxu0 %v5011_v56 }
 0x16b   : > { %4597 = vmatpush3.bf16.msra.mxu1 %v5012_v61  ;;  %4576 = vmatprep.subr.bf16.mxu0 %v5013_v3 }
 0x16c   : > { %4598 = vmatprep.subr.bf16.mxu1 %v5014_v4  ;;  %v5706_v10 = vpop.f32.mrb[24].mxu0  ;;  %v5031_v4 = vld [vmem:[#allocation7 + $0x230] sm:$0xff]  }
 0x16d   : > { %v5708_v14 = vpop.f32.mrb[25].mxu0  ;;  %v5710_v15 = vpop.f32.mrb[24].mxu1 }
 0x16e   : > { %4577 = vmatpush3.bf16.msra.mxu0 %v5015_v7  ;;  %v1157_v19 = vpop.f32.mrb[26].mxu0  ;;  %v5712_v20 = vpop.f32.mrb[25].mxu1  ;;  %v5034_v7 = vld [vmem:[#allocation7 + $0x2f8] sm:$0xff]  }
 0x16f   : > { %4599 = vmatpush3.bf16.msra.mxu1 %v5016_v8  ;;  %4578 = vmatprep.subr.bf16.mxu0 %v5017_v9  ;;  %v1158_v22 = vpop.f32.mrb[27].mxu0  ;;  %v1198_v23 = vpop.f32.mrb[26].mxu1  ;;  %v910_v8 = vadd.f32 %v5680_v37, %v341_v48  ;;  %v951_v9 = vadd.f32 %v5682_v1, %v349_v49  ;;  %v5040_v37 = vld [vmem:[#allocation7 + $0x380] sm:$0xff]   ;;  %v5041_v1 = vld [vmem:[#allocation7 + $0x348] sm:$0xff]   ;;  %v5051_v48 = vld [vmem:[#allocation7 + $0x318] sm:$0xff]  }
 0x170   : > { %4600 = vmatprep.subr.bf16.mxu1 %v5018_v39  ;;  %v1199_v0 = vpop.f32.mrb[27].mxu1  ;;  %v1291_v39 = vmax.f32 %v826_v62, 0.0  ;;  %v5052_v49 = vld [vmem:[#allocation7 + $0x398] sm:$0xff]   ;;  %v5055_v62 = vld [vmem:[#allocation7 + $0x320] sm:$0xff]  }
 0x171   : > { %v1298_v19 = vmax.f32 %v951_v9, 0.0  ;;  %v5039_v0 = vld [vmem:[#allocation7 + $0x300] sm:$0xff]   ;;  %v5060_v9 = vld [vmem:[#allocation7 + $0x3a8] sm:$0xff]  }
 0x172   : > { %4579 = vmatpush3.bf16.msra.mxu0 %v5019_v11  ;;  %v1293_v11 = vmax.f32 %v867_v2, 0.0  ;;  %v1323_v22 = vpack.c.bf16 %v1291_v39, %v1291_v39  ;;  %v5056_v2 = vld [vmem:[#allocation7 + $0x3a0] sm:$0xff]   ;;  %v5061_v39 = vld [vmem:[#allocation7 + $0x370] sm:$0xff]  }
 0x173   : > { %4601 = vmatpush3.bf16.msra.mxu1 %v5020_v13  ;;  %4580 = vmatprep.subr.bf16.mxu0 %v5021_v16  ;;  %v5036_v13 = vld [vmem:[#allocation7 + $0x2b8] sm:$0xff]   ;;  %v5038_v16 = vld [vmem:[#allocation7 + $0x3c0] sm:$0xff]  }
 0x174   : > { %4602 = vmatprep.subr.bf16.mxu1 %v5022_v18  ;;  %v5714_v29 = vpop.f32.mrb[28].mxu0  ;;  %v1296_v18 = vmax.f32 %v910_v8, 0.0  ;;  %v1325_v23 = vpack.c.bf16 %v1293_v11, %v1293_v11  ;;  %v5059_v8 = vld [vmem:[#allocation7 + $0x328] sm:$0xff]   ;;  %v5062_v11 = vld [vmem:[#allocation7 + $0x3f0] sm:$0xff]  }
 0x175   : > { %v5720_v36 = vpop.f32.mrb[29].mxu0  ;;  %v5722_v43 = vpop.f32.mrb[28].mxu1 }
 0x176   : > { %4581 = vmatpush3.bf16.msra.mxu0 %v5023_v25  ;;  %v1239_v46 = vpop.f32.mrb[30].mxu0  ;;  %v5724_v47 = vpop.f32.mrb[29].mxu1  ;;  %v5042_v25 = vld [vmem:[#allocation7 + $0x3c8] sm:$0xff]  }
 0x177   : > { %4603 = vmatpush3.bf16.msra.mxu1 %v5024_v26  ;;  %4582 = vmatprep.subr.bf16.mxu0 %v5025_v27  ;;  %v1240_v56 = vpop.f32.mrb[31].mxu0  ;;  %v1280_v61 = vpop.f32.mrb[30].mxu1  ;;  %v1328_v26 = vpack.c.bf16 %v1296_v18, %v1296_v18  ;;  %v1330_v27 = vpack.c.bf16 %v1298_v19, %v1298_v19  ;;  %v5050_v46 = vld [vmem:[#allocation7 + $0x3d8] sm:$0xff]   ;;  %v5064_v18 = vld [vmem:[#allocation7 + $0x3b0] sm:$0xff]  }
 0x178   : > { %4604 = vmatprep.subr.bf16.mxu1 %v5026_v28  ;;  %v1281_v3 = vpop.f32.mrb[31].mxu1  ;;  %v5043_v28 = vld [vmem:[#allocation7 + $0x308] sm:$0xff]   ;;  %v5053_v56 = vld [vmem:[#allocation7 + $0x360] sm:$0xff]   ;;  %v5065_v19 = vld [vmem:[#allocation7 + $0x378] sm:$0xff]  }
 0x179   : > { %v5054_v61 = vld [vmem:[#allocation7 + $0x3e0] sm:$0xff]   ;;  %v5057_v3 = vld [vmem:[#allocation7 + $0x368] sm:$0xff]  }
 0x17a   : > { %4583 = vmatpush3.bf16.msra.mxu0 %v5027_v32  ;;  %v5046_v32 = vld [vmem:[#allocation7 + $0x3d0] sm:$0xff]  }
 0x17b   : > { %4605 = vmatpush3.bf16.msra.mxu1 %v5028_v35  ;;  %4584 = vmatprep.subr.bf16.mxu0 %v5029_v44  ;;  %v5047_v35 = vld [vmem:[#allocation7 + $0x310] sm:$0xff]  }
 0x17c   : > { %4606 = vmatprep.subr.bf16.mxu1 %v5030_v45  ;;  %v5048_v44 = vld [vmem:[#allocation7 + $0x390] sm:$0xff]   ;;  %v5049_v45 = vld [vmem:[#allocation7 + $0x358] sm:$0xff]  }
 0x17e   : > { %4585 = vmatpush3.bf16.msra.mxu0 %v5031_v4  ;;  %v5058_v4 = vld [vmem:[#allocation7 + $0x3e8] sm:$0xff]  }
 0x17f   : > { %4607 = vmatpush3.bf16.msra.mxu1 %v5032_v5  ;;  %4586 = vmatprep.subr.bf16.mxu0 %v5033_v6  ;;  %v337_v5 = vrot.slane %v5678_v63, %v5665_v52  ;;  %v345_v6 = vrot.slane %v5678_v63, %v5668_v53 }
 0x180   : > { %4608 = vmatprep.subr.bf16.mxu1 %v5034_v7  ;;  %v5738_v7 = vld [vmem:[#allocation5 + $0x10] sm:$0xff] }
 0x181   : > { %v949_v63 = vadd.f32 %v5672_v60, %v345_v6  ;;  %v5069_v60 = vld [vmem:[#allocation7 + $0x440] sm:$0xff]  }
 0x182   : > { %4587 = vmatpush3.bf16.msra.mxu0 %v5035_v33  ;;  %v357_v33 = vrot.slane %v5738_v7, %v5633_v41  ;;  %v5085_v6 = vld [vmem:[#allocation7 + $0x460] sm:$0xff]  }
 0x183   : > { %4609 = vmatpush3.bf16.msra.mxu1 %v5036_v13  ;;  %4616 = vmatprep.subr.bf16.mxu0 %v5037_v34  ;;  %v365_v13 = vrot.slane %v5738_v7, %v5636_v42  ;;  %v908_v34 = vadd.f32 %v5670_v59, %v337_v5  ;;  %v5068_v59 = vld [vmem:[#allocation7 + $0x3b8] sm:$0xff]  }
 0x184   : > { %4638 = vmatprep.subr.bf16.mxu1 %v5038_v16  ;;  %v5063_v16 = vld [vmem:[#allocation7 + $0x330] sm:$0xff]   ;;  %v5084_v5 = vld [vmem:[#allocation7 + $0x498] sm:$0xff]  }
 0x185   : > { %3595 = vmatmul.mubr.bf16.vlgmr.msra.gmra.mrb[40].mxu0 %v1323_v22  ;;  %v5066_v22 = vld [vmem:[#allocation7 + $0x3f8] sm:$0xff]  }
 0x186   : > { %3635 = vmatmul.mubr.bf16.vlgmr.msra.gmra.mrb[40].mxu1 %v1325_v23  ;;  %4617 = vmatpush3.bf16.msra.mxu0 %v5039_v0  ;;  %v992_v23 = vadd.f32 %v5694_v24, %v357_v33  ;;  %v1033_v0 = vadd.f32 %v5696_v12, %v365_v13  ;;  %v5072_v24 = vld [vmem:[#allocation7 + $0x480] sm:$0xff]   ;;  %v5073_v12 = vld [vmem:[#allocation7 + $0x448] sm:$0xff]   ;;  %v353_v13 = vrot.slane %v5738_v7, %v5625_v38 }
 0x187   : > { %4639 = vmatpush3.bf16.msra.mxu1 %v5040_v37  ;;  %4618 = vmatprep.subr.bf16.mxu0 %v5041_v1  ;;  %v1295_v37 = vmax.f32 %v908_v34, 0.0  ;;  %v1297_v1 = vmax.f32 %v949_v63, 0.0  ;;  %v5090_v33 = vld [vmem:[#allocation7 + $0x4e8] sm:$0xff]   ;;  %v361_v34 = vrot.slane %v5738_v7, %v5630_v40 }
 0x188   : > { %4640 = vmatprep.subr.bf16.mxu1 %v5042_v25  ;;  %3674 = vmatprep.mubr.bf16.mxu0 %v1328_v26  ;;  %v5067_v25 = vld [vmem:[#allocation7 + $0x338] sm:$0xff]   ;;  %v5070_v26 = vld [vmem:[#allocation7 + $0x4c0] sm:$0xff]   ;;  %v5091_v63 = vld [vmem:[#allocation7 + $0x428] sm:$0xff]  }
 0x189   : > { %3714 = vmatprep.mubr.bf16.mxu1 %v1330_v27  ;;  %v1300_v27 = vmax.f32 %v992_v23, 0.0  ;;  %v381_v23 = vrot.slane %v5738_v7, %v5650_v58 }
 0x18a   : > { %4619 = vmatpush3.bf16.msra.mxu0 %v5043_v28  ;;  %v1302_v28 = vmax.f32 %v1033_v0, 0.0  ;;  %v990_v0 = vadd.f32 %v5690_v17, %v353_v13  ;;  %v5100_v17 = vld [vmem:[#allocation7 + $0x4b8] sm:$0xff]   ;;  %v5120_v13 = vld [vmem:[#allocation7 + $0x5a0] sm:$0xff]  }
 0x18b   : > { %4641 = vmatpush3.bf16.msra.mxu1 %v5044_v30  ;;  %4620 = vmatprep.subr.bf16.mxu0 %v5045_v31  ;;  %v1327_v30 = vpack.c.bf16 %v1295_v37, %v1295_v37  ;;  %v1329_v31 = vpack.c.bf16 %v1297_v1, %v1297_v1  ;;  %v1031_v37 = vadd.f32 %v5692_v21, %v361_v34  ;;  %v5095_v1 = vld [vmem:[#allocation7 + $0x430] sm:$0xff]   ;;  %v5101_v21 = vld [vmem:[#allocation7 + $0x540] sm:$0xff]   ;;  %v5121_v34 = vld [vmem:[#allocation7 + $0x568] sm:$0xff]  }
 0x18c   : > { %4642 = vmatprep.subr.bf16.mxu1 %v5046_v32  ;;  %v5071_v32 = vld [vmem:[#allocation7 + $0x400] sm:$0xff]  }
 0x18e   : > { %4621 = vmatpush3.bf16.msra.mxu0 %v5047_v35  ;;  %v5074_v35 = vld [vmem:[#allocation7 + $0x4c8] sm:$0xff]  }
 0x18f   : > { %4643 = vmatpush3.bf16.msra.mxu1 %v5048_v44  ;;  %4622 = vmatprep.subr.bf16.mxu0 %v5049_v45  ;;  %v1332_v44 = vpack.c.bf16 %v1300_v27, %v1300_v27  ;;  %v1334_v45 = vpack.c.bf16 %v1302_v28, %v1302_v28  ;;  %v1115_v27 = vadd.f32 %v5704_v55, %v381_v23  ;;  %v1299_v28 = vmax.f32 %v990_v0, 0.0  ;;  %v5105_v55 = vld [vmem:[#allocation7 + $0x548] sm:$0xff]   ;;  %v5125_v0 = vld [vmem:[#allocation7 + $0x570] sm:$0xff]  }
 0x190   : > { %4644 = vmatprep.subr.bf16.mxu1 %v5050_v46  ;;  %v5075_v46 = vld [vmem:[#allocation7 + $0x408] sm:$0xff]  }
 0x191   : > { %v5124_v23 = vld [vmem:[#allocation7 + $0x5a8] sm:$0xff]  }
 0x192   : > { %4623 = vmatpush3.bf16.msra.mxu0 %v5051_v48  ;;  %v5076_v48 = vld [vmem:[#allocation7 + $0x488] sm:$0xff]  }
 0x193   : > { %4645 = vmatpush3.bf16.msra.mxu1 %v5052_v49  ;;  %4624 = vmatprep.subr.bf16.mxu0 %v5053_v56  ;;  %v5077_v49 = vld [vmem:[#allocation7 + $0x450] sm:$0xff]  }
 0x194   : > { %4646 = vmatprep.subr.bf16.mxu1 %v5054_v61  ;;  %v5078_v56 = vld [vmem:[#allocation7 + $0x4d0] sm:$0xff]  }
 0x195   : > { %v5079_v61 = vld [vmem:[#allocation7 + $0x410] sm:$0xff]  }
 0x196   : > { %4625 = vmatpush3.bf16.msra.mxu0 %v5055_v62  ;;  %v5080_v62 = vld [vmem:[#allocation7 + $0x490] sm:$0xff]  }
 0x197   : > { %4647 = vmatpush3.bf16.msra.mxu1 %v5056_v2  ;;  %4626 = vmatprep.subr.bf16.mxu0 %v5057_v3  ;;  %v5081_v2 = vld [vmem:[#allocation7 + $0x458] sm:$0xff]  }
 0x198   : > { %4648 = vmatprep.subr.bf16.mxu1 %v5058_v4  ;;  %v5082_v3 = vld [vmem:[#allocation7 + $0x4d8] sm:$0xff]  }
 0x199   : > { %v5083_v4 = vld [vmem:[#allocation7 + $0x418] sm:$0xff]  }
 0x19a   : > { %4627 = vmatpush3.bf16.msra.mxu0 %v5059_v8  ;;  %v5086_v8 = vld [vmem:[#allocation7 + $0x4e0] sm:$0xff]  }
 0x19b   : > { %4649 = vmatpush3.bf16.msra.mxu1 %v5060_v9  ;;  %4628 = vmatprep.subr.bf16.mxu0 %v5061_v39  ;;  %v5087_v9 = vld [vmem:[#allocation7 + $0x420] sm:$0xff]  }
 0x19c   : > { %4650 = vmatprep.subr.bf16.mxu1 %v5062_v11  ;;  %v5088_v39 = vld [vmem:[#allocation7 + $0x4a0] sm:$0xff]   ;;  %v5089_v11 = vld [vmem:[#allocation7 + $0x468] sm:$0xff]  }
 0x19e   : > { %4629 = vmatpush3.bf16.msra.mxu0 %v5063_v16  ;;  %v5092_v16 = vld [vmem:[#allocation7 + $0x4a8] sm:$0xff]  }
 0x19f   : > { %4651 = vmatpush3.bf16.msra.mxu1 %v5064_v18  ;;  %4630 = vmatprep.subr.bf16.mxu0 %v5065_v19  ;;  %v5093_v18 = vld [vmem:[#allocation7 + $0x470] sm:$0xff]  }
 0x1a0   : > { %4652 = vmatprep.subr.bf16.mxu1 %v5066_v22  ;;  %v5094_v19 = vld [vmem:[#allocation7 + $0x4f0] sm:$0xff]   ;;  %v373_v22 = vrot.slane %v5738_v7, %v5647_v57 }
 0x1a2   : > { %4631 = vmatpush3.bf16.msra.mxu0 %v5067_v25  ;;  %v5096_v25 = vld [vmem:[#allocation7 + $0x4b0] sm:$0xff]  }
 0x1a3   : > { %4653 = vmatpush3.bf16.msra.mxu1 %v5068_v59  ;;  %4660 = vmatprep.subr.bf16.mxu0 %v5069_v60  ;;  %v5097_v59 = vld [vmem:[#allocation7 + $0x478] sm:$0xff]  }
 0x1a4   : > { %4682 = vmatprep.subr.bf16.mxu1 %v5070_v26  ;;  %v5098_v60 = vld [vmem:[#allocation7 + $0x4f8] sm:$0xff]   ;;  %v1074_v26 = vadd.f32 %v5702_v54, %v373_v22  ;;  %v5104_v54 = vld [vmem:[#allocation7 + $0x580] sm:$0xff]   ;;  %v5123_v22 = vld [vmem:[#allocation7 + $0x528] sm:$0xff]  }
 0x1a5   : > { %3675 = vmatmul.mubr.bf16.vlgmr.msra.gmra.mrb[44].mxu0 %v1327_v30  ;;  %v1301_v30 = vmax.f32 %v1031_v37, 0.0  ;;  %v5126_v37 = vld [vmem:[#allocation7 + $0x5f0] sm:$0xff]  }
 0x1a6   : > { %3715 = vmatmul.mubr.bf16.vlgmr.msra.gmra.mrb[44].mxu1 %v1329_v31  ;;  %4661 = vmatpush3.bf16.msra.mxu0 %v5071_v32  ;;  %v5099_v31 = vld [vmem:[#allocation7 + $0x438] sm:$0xff]   ;;  %v5102_v32 = vld [vmem:[#allocation7 + $0x5c0] sm:$0xff]  }
 0x1a7   : > { %4683 = vmatpush3.bf16.msra.mxu1 %v5072_v24  ;;  %4662 = vmatprep.subr.bf16.mxu0 %v5073_v12  ;;  %v1304_v24 = vmax.f32 %v1074_v26, 0.0  ;;  %v1306_v12 = vmax.f32 %v1115_v27, 0.0  ;;  %v5128_v26 = vld [vmem:[#allocation7 + $0x5b0] sm:$0xff]   ;;  %v5129_v27 = vld [vmem:[#allocation7 + $0x578] sm:$0xff]  }
 0x1a8   : > { %4684 = vmatprep.subr.bf16.mxu1 %v5074_v35  ;;  %3754 = vmatprep.mubr.bf16.mxu0 %v1332_v44  ;;  %v1331_v35 = vpack.c.bf16 %v1299_v28, %v1299_v28  ;;  %v1333_v44 = vpack.c.bf16 %v1301_v30, %v1301_v30  ;;  %v5130_v28 = vld [vmem:[#allocation7 + $0x5f8] sm:$0xff]  }
 0x1a9   : > { %3794 = vmatprep.mubr.bf16.mxu1 %v1334_v45  ;;  %v5103_v45 = vld [vmem:[#allocation7 + $0x500] sm:$0xff]  }
 0x1aa   : > { %4663 = vmatpush3.bf16.msra.mxu0 %v5075_v46  ;;  %v5106_v46 = vld [vmem:[#allocation7 + $0x5c8] sm:$0xff]  }
 0x1ab   : > { %4685 = vmatpush3.bf16.msra.mxu1 %v5076_v48  ;;  %4664 = vmatprep.subr.bf16.mxu0 %v5077_v49  ;;  %v1336_v48 = vpack.c.bf16 %v1304_v24, %v1304_v24  ;;  %v1338_v49 = vpack.c.bf16 %v1306_v12, %v1306_v12 }
 0x1ac   : > { %4686 = vmatprep.subr.bf16.mxu1 %v5078_v56  ;;  %v5107_v56 = vld [vmem:[#allocation7 + $0x508] sm:$0xff]  }
 0x1ae   : > { %4665 = vmatpush3.bf16.msra.mxu0 %v5079_v61  ;;  %v5108_v61 = vld [vmem:[#allocation7 + $0x588] sm:$0xff]  }
 0x1af   : > { %4687 = vmatpush3.bf16.msra.mxu1 %v5080_v62  ;;  %4666 = vmatprep.subr.bf16.mxu0 %v5081_v2  ;;  %v5109_v62 = vld [vmem:[#allocation7 + $0x550] sm:$0xff]  }
 0x1b0   : > { %4688 = vmatprep.subr.bf16.mxu1 %v5082_v3  ;;  %v5110_v2 = vld [vmem:[#allocation7 + $0x5d0] sm:$0xff]  }
 0x1b1   : > { %v5111_v3 = vld [vmem:[#allocation7 + $0x510] sm:$0xff]  }
 0x1b2   : > { %4667 = vmatpush3.bf16.msra.mxu0 %v5083_v4  ;;  %v5112_v4 = vld [vmem:[#allocation7 + $0x590] sm:$0xff]  }
 0x1b3   : > { %4689 = vmatpush3.bf16.msra.mxu1 %v5084_v5  ;;  %4668 = vmatprep.subr.bf16.mxu0 %v5085_v6  ;;  %v5113_v5 = vld [vmem:[#allocation7 + $0x558] sm:$0xff]  }
 0x1b4   : > { %4690 = vmatprep.subr.bf16.mxu1 %v5086_v8  ;;  %v5114_v6 = vld [vmem:[#allocation7 + $0x5d8] sm:$0xff]  }
 0x1b5   : > { %v5115_v8 = vld [vmem:[#allocation7 + $0x518] sm:$0xff]  }
 0x1b6   : > { %4669 = vmatpush3.bf16.msra.mxu0 %v5087_v9  ;;  %v5116_v9 = vld [vmem:[#allocation7 + $0x598] sm:$0xff]  }
 0x1b7   : > { %4691 = vmatpush3.bf16.msra.mxu1 %v5088_v39  ;;  %4670 = vmatprep.subr.bf16.mxu0 %v5089_v11  ;;  %v5117_v39 = vld [vmem:[#allocation7 + $0x560] sm:$0xff]  }
 0x1b8   : > { %4692 = vmatprep.subr.bf16.mxu1 %v5090_v33  ;;  %v5118_v11 = vld [vmem:[#allocation7 + $0x5e0] sm:$0xff]  }
 0x1b9   : > { %v5119_v33 = vld [vmem:[#allocation7 + $0x520] sm:$0xff]  }
 0x1ba   : > { %4671 = vmatpush3.bf16.msra.mxu0 %v5091_v63  ;;  %v5122_v63 = vld [vmem:[#allocation7 + $0x5e8] sm:$0xff]  }
 0x1bb   : > { %4693 = vmatpush3.bf16.msra.mxu1 %v5092_v16  ;;  %4672 = vmatprep.subr.bf16.mxu0 %v5093_v18  ;;  %v369_v16 = vrot.slane %v5738_v7, %v5665_v52  ;;  %v377_v18 = vrot.slane %v5738_v7, %v5668_v53 }
 0x1bc   : > { %4694 = vmatprep.subr.bf16.mxu1 %v5094_v19  ;;  %v5764_v19 = vld [vmem:[#allocation5 + $0x18] sm:$0xff] }
 0x1bd   : > { %v1113_v7 = vadd.f32 %v5700_v51, %v377_v18  ;;  %v5133_v51 = vld [vmem:[#allocation7 + $0x640] sm:$0xff]   ;;  %v5157_v18 = vld [vmem:[#allocation7 + $0x670] sm:$0xff]  }
 0x1be   : > { %4673 = vmatpush3.bf16.msra.mxu0 %v5095_v1  ;;  %v389_v1 = vrot.slane %v5764_v19, %v5633_v41 }
 0x1bf   : > { %4695 = vmatpush3.bf16.msra.mxu1 %v5096_v25  ;;  %4674 = vmatprep.subr.bf16.mxu0 %v5097_v59  ;;  %v397_v25 = vrot.slane %v5764_v19, %v5636_v42  ;;  %v1072_v59 = vadd.f32 %v5698_v50, %v369_v16  ;;  %v5131_v42 = vld [vmem:[#allocation7 + $0x538] sm:$0xff]   ;;  %v393_v16 = vrot.slane %v5764_v19, %v5630_v40 }
 0x1c0   : > { %4696 = vmatprep.subr.bf16.mxu1 %v5098_v60  ;;  %v5127_v60 = vld [vmem:[#allocation7 + $0x530] sm:$0xff]   ;;  %v1156_v30 = vadd.f32 %v5708_v14, %v389_v1  ;;  %v5132_v50 = vld [vmem:[#allocation7 + $0x5b8] sm:$0xff]   ;;  %v5136_v14 = vld [vmem:[#allocation7 + $0x680] sm:$0xff]  }
 0x1c1   : > { %v1303_v41 = vmax.f32 %v1072_v59, 0.0  ;;  %v5160_v1 = vld [vmem:[#allocation7 + $0x6b0] sm:$0xff]   ;;  %v5161_v40 = vld [vmem:[#allocation7 + $0x678] sm:$0xff]  }
 0x1c2   : > { %4675 = vmatpush3.bf16.msra.mxu0 %v5099_v31  ;;  %v1197_v31 = vadd.f32 %v5712_v20, %v397_v25  ;;  %v5137_v20 = vld [vmem:[#allocation7 + $0x648] sm:$0xff]   ;;  %v5162_v59 = vld [vmem:[#allocation7 + $0x6f8] sm:$0xff]  }
 0x1c3   : > { %4697 = vmatpush3.bf16.msra.mxu1 %v5100_v17  ;;  %4704 = vmatprep.subr.bf16.mxu0 %v5101_v21  ;;  %v1305_v17 = vmax.f32 %v1113_v7, 0.0  ;;  %v5134_v21 = vld [vmem:[#allocation7 + $0x6c0] sm:$0xff]   ;;  %v1335_v12 = vpack.c.bf16 %v1303_v41, %v1303_v41 }
 0x1c4   : > { %4726 = vmatprep.subr.bf16.mxu1 %v5102_v32  ;;  %v1308_v32 = vmax.f32 %v1156_v30, 0.0  ;;  %v1310_v24 = vmax.f32 %v1197_v31, 0.0  ;;  %v5167_v31 = vld [vmem:[#allocation7 + $0x700] sm:$0xff]  }
 0x1c5   : > { %3755 = vmatmul.mubr.bf16.vlgmr.msra.gmra.mrb[48].mxu0 %v1331_v35  ;;  %v1337_v35 = vpack.c.bf16 %v1305_v17, %v1305_v17 }
 0x1c6   : > { %3795 = vmatmul.mubr.bf16.vlgmr.msra.gmra.mrb[48].mxu1 %v1333_v44  ;;  %4705 = vmatpush3.bf16.msra.mxu0 %v5103_v45  ;;  %v5135_v44 = vld [vmem:[#allocation7 + $0x600] sm:$0xff]   ;;  %v5138_v45 = vld [vmem:[#allocation7 + $0x6c8] sm:$0xff]  }
 0x1c7   : > { %4727 = vmatpush3.bf16.msra.mxu1 %v5104_v54  ;;  %4706 = vmatprep.subr.bf16.mxu0 %v5105_v55  ;;  %v1340_v54 = vpack.c.bf16 %v1308_v32, %v1308_v32  ;;  %v1342_v55 = vpack.c.bf16 %v1310_v24, %v1310_v24  ;;  %v5172_v32 = vld [vmem:[#allocation7 + $0x788] sm:$0xff]   ;;  %v5173_v24 = vld [vmem:[#allocation7 + $0x750] sm:$0xff]  }
 0x1c8   : > { %4728 = vmatprep.subr.bf16.mxu1 %v5106_v46  ;;  %3834 = vmatprep.mubr.bf16.mxu0 %v1336_v48  ;;  %v5139_v46 = vld [vmem:[#allocation7 + $0x608] sm:$0xff]  }
 0x1c9   : > { %3874 = vmatprep.mubr.bf16.mxu1 %v1338_v49  ;;  %v5140_v48 = vld [vmem:[#allocation7 + $0x688] sm:$0xff]   ;;  %v5141_v49 = vld [vmem:[#allocation7 + $0x650] sm:$0xff]  }
 0x1ca   : > { %4707 = vmatpush3.bf16.msra.mxu0 %v5107_v56  ;;  %v5142_v56 = vld [vmem:[#allocation7 + $0x6d0] sm:$0xff]  }
 0x1cb   : > { %4729 = vmatpush3.bf16.msra.mxu1 %v5108_v61  ;;  %4708 = vmatprep.subr.bf16.mxu0 %v5109_v62  ;;  %v5143_v61 = vld [vmem:[#allocation7 + $0x610] sm:$0xff]  }
 0x1cc   : > { %4730 = vmatprep.subr.bf16.mxu1 %v5110_v2  ;;  %v5144_v62 = vld [vmem:[#allocation7 + $0x690] sm:$0xff]   ;;  %v5145_v2 = vld [vmem:[#allocation7 + $0x658] sm:$0xff]  }
 0x1ce   : > { %4709 = vmatpush3.bf16.msra.mxu0 %v5111_v3  ;;  %v5146_v3 = vld [vmem:[#allocation7 + $0x6d8] sm:$0xff]  }
 0x1cf   : > { %4731 = vmatpush3.bf16.msra.mxu1 %v5112_v4  ;;  %4710 = vmatprep.subr.bf16.mxu0 %v5113_v5  ;;  %v5147_v4 = vld [vmem:[#allocation7 + $0x618] sm:$0xff]  }
 0x1d0   : > { %4732 = vmatprep.subr.bf16.mxu1 %v5114_v6  ;;  %v5148_v5 = vld [vmem:[#allocation7 + $0x698] sm:$0xff]   ;;  %v5149_v6 = vld [vmem:[#allocation7 + $0x660] sm:$0xff]  }
 0x1d2   : > { %4711 = vmatpush3.bf16.msra.mxu0 %v5115_v8  ;;  %v5150_v8 = vld [vmem:[#allocation7 + $0x6e0] sm:$0xff]  }
 0x1d3   : > { %4733 = vmatpush3.bf16.msra.mxu1 %v5116_v9  ;;  %4712 = vmatprep.subr.bf16.mxu0 %v5117_v39  ;;  %v5151_v9 = vld [vmem:[#allocation7 + $0x620] sm:$0xff]  }
 0x1d4   : > { %4734 = vmatprep.subr.bf16.mxu1 %v5118_v11  ;;  %v5152_v39 = vld [vmem:[#allocation7 + $0x6a0] sm:$0xff]   ;;  %v5153_v11 = vld [vmem:[#allocation7 + $0x668] sm:$0xff]  }
 0x1d6   : > { %4713 = vmatpush3.bf16.msra.mxu0 %v5119_v33  ;;  %v5154_v33 = vld [vmem:[#allocation7 + $0x6e8] sm:$0xff]  }
 0x1d7   : > { %4735 = vmatpush3.bf16.msra.mxu1 %v5120_v13  ;;  %4714 = vmatprep.subr.bf16.mxu0 %v5121_v34  ;;  %v5155_v13 = vld [vmem:[#allocation7 + $0x628] sm:$0xff]  }
 0x1d8   : > { %4736 = vmatprep.subr.bf16.mxu1 %v5122_v63  ;;  %v5156_v34 = vld [vmem:[#allocation7 + $0x6a8] sm:$0xff]   ;;  %v385_v63 = vrot.slane %v5764_v19, %v5625_v38  ;;  %v1195_v38 = vadd.f32 %v5710_v15, %v393_v16  ;;  %v5191_v16 = vld [vmem:[#allocation7 + $0x730] sm:$0xff]  }
 0x1da   : > { %4715 = vmatpush3.bf16.msra.mxu0 %v5123_v22  ;;  %v5158_v22 = vld [vmem:[#allocation7 + $0x6f0] sm:$0xff]   ;;  %v1154_v25 = vadd.f32 %v5706_v10, %v385_v63  ;;  %v5166_v10 = vld [vmem:[#allocation7 + $0x7c0] sm:$0xff]  }
 0x1db   : > { %4737 = vmatpush3.bf16.msra.mxu1 %v5124_v23  ;;  %4716 = vmatprep.subr.bf16.mxu0 %v5125_v0  ;;  %v405_v23 = vrot.slane %v5764_v19, %v5647_v57  ;;  %v413_v0 = vrot.slane %v5764_v19, %v5650_v58  ;;  %v5163_v57 = vld [vmem:[#allocation7 + $0x638] sm:$0xff]  }
 0x1dc   : > { %4738 = vmatprep.subr.bf16.mxu1 %v5126_v37  ;;  %v5159_v37 = vld [vmem:[#allocation7 + $0x630] sm:$0xff]   ;;  %v5164_v58 = vld [vmem:[#allocation7 + $0x6b8] sm:$0xff]  }
 0x1dd   : > { %v1238_v7 = vadd.f32 %v5720_v36, %v405_v23  ;;  %v5168_v36 = vld [vmem:[#allocation7 + $0x780] sm:$0xff]   ;;  %v5193_v23 = vld [vmem:[#allocation7 + $0x778] sm:$0xff]  }
 0x1de   : > { %4717 = vmatpush3.bf16.msra.mxu0 %v5127_v60  ;;  %v1279_v60 = vadd.f32 %v5724_v47, %v413_v0 }
 0x1df   : > { %4739 = vmatpush3.bf16.msra.mxu1 %v5128_v26  ;;  %4718 = vmatprep.subr.bf16.mxu0 %v5129_v27  ;;  %v1307_v26 = vmax.f32 %v1154_v25, 0.0  ;;  %v1309_v27 = vmax.f32 %v1195_v38, 0.0  ;;  %v1312_v30 = vmax.f32 %v1238_v7, 0.0  ;;  %v5195_v38 = vld [vmem:[#allocation7 + $0x738] sm:$0xff]  }
 0x1e0   : > { %4740 = vmatprep.subr.bf16.mxu1 %v5130_v28  ;;  %v5165_v28 = vld [vmem:[#allocation7 + $0x740] sm:$0xff]   ;;  %v1314_v15 = vmax.f32 %v1279_v60, 0.0 }
 0x1e1   : > { %v1339_v41 = vpack.c.bf16 %v1307_v26, %v1307_v26  ;;  %v1341_v17 = vpack.c.bf16 %v1309_v27, %v1309_v27  ;;  %v1344_v47 = vpack.c.bf16 %v1312_v30, %v1312_v30 }
 0x1e2   : > { %4719 = vmatpush3.bf16.msra.mxu0 %v5131_v42  ;;  %v5169_v42 = vld [vmem:[#allocation7 + $0x748] sm:$0xff]  }
 0x1e3   : > { %4741 = vmatpush3.bf16.msra.mxu1 %v5132_v50  ;;  %4748 = vmatprep.subr.bf16.mxu0 %v5133_v51  ;;  %v5170_v50 = vld [vmem:[#allocation7 + $0x7c8] sm:$0xff]   ;;  %v1346_v51 = vpack.c.bf16 %v1314_v15, %v1314_v15 }
 0x1e4   : > { %4770 = vmatprep.subr.bf16.mxu1 %v5134_v21  ;;  %v5171_v21 = vld [vmem:[#allocation7 + $0x708] sm:$0xff]  }
 0x1e5   : > { %3835 = vmatmul.mubr.bf16.vlgmr.msra.gmra.mrb[52].mxu0 %v1335_v12  ;;  %v5174_v12 = vld [vmem:[#allocation7 + $0x7d0] sm:$0xff]  }
 0x1e6   : > { %3875 = vmatmul.mubr.bf16.vlgmr.msra.gmra.mrb[52].mxu1 %v1337_v35  ;;  %4749 = vmatpush3.bf16.msra.mxu0 %v5135_v44  ;;  %v5175_v35 = vld [vmem:[#allocation7 + $0x710] sm:$0xff]  }
 0x1e7   : > { %4771 = vmatpush3.bf16.msra.mxu1 %v5136_v14  ;;  %4750 = vmatprep.subr.bf16.mxu0 %v5137_v20  ;;  %v5176_v44 = vld [vmem:[#allocation7 + $0x790] sm:$0xff]   ;;  %v5177_v14 = vld [vmem:[#allocation7 + $0x758] sm:$0xff]  }
 0x1e8   : > { %4772 = vmatprep.subr.bf16.mxu1 %v5138_v45  ;;  %3914 = vmatprep.mubr.bf16.mxu0 %v1340_v54  ;;  %v5178_v20 = vld [vmem:[#allocation7 + $0x7d8] sm:$0xff]  }
 0x1e9   : > { %3954 = vmatprep.mubr.bf16.mxu1 %v1342_v55  ;;  %v5179_v45 = vld [vmem:[#allocation7 + $0x718] sm:$0xff]   ;;  %v5181_v55 = vld [vmem:[#allocation7 + $0x760] sm:$0xff]  }
 0x1ea   : > { %4751 = vmatpush3.bf16.msra.mxu0 %v5139_v46  ;;  %v5180_v54 = vld [vmem:[#allocation7 + $0x798] sm:$0xff]   ;;  %v5182_v46 = vld [vmem:[#allocation7 + $0x7e0] sm:$0xff]  }
 0x1eb   : > { %4773 = vmatpush3.bf16.msra.mxu1 %v5140_v48  ;;  %4752 = vmatprep.subr.bf16.mxu0 %v5141_v49  ;;  %v5183_v48 = vld [vmem:[#allocation7 + $0x720] sm:$0xff]  }
 0x1ec   : > { %4774 = vmatprep.subr.bf16.mxu1 %v5142_v56  ;;  %v5184_v49 = vld [vmem:[#allocation7 + $0x7a0] sm:$0xff]   ;;  %v5185_v56 = vld [vmem:[#allocation7 + $0x768] sm:$0xff]  }
 0x1ee   : > { %4753 = vmatpush3.bf16.msra.mxu0 %v5143_v61  ;;  %v5186_v61 = vld [vmem:[#allocation7 + $0x7e8] sm:$0xff]  }
 0x1ef   : > { %4775 = vmatpush3.bf16.msra.mxu1 %v5144_v62  ;;  %4754 = vmatprep.subr.bf16.mxu0 %v5145_v2  ;;  %v5187_v62 = vld [vmem:[#allocation7 + $0x728] sm:$0xff]   ;;  %v401_v2 = vrot.slane %v5764_v19, %v5665_v52 }
 0x1f0   : > { %4776 = vmatprep.subr.bf16.mxu1 %v5146_v3  ;;  %v5188_v3 = vld [vmem:[#allocation7 + $0x7a8] sm:$0xff]  }
 0x1f2   : > { %4755 = vmatpush3.bf16.msra.mxu0 %v5147_v4  ;;  %v5189_v4 = vld [vmem:[#allocation7 + $0x770] sm:$0xff]  }
 0x1f3   : > { %4777 = vmatpush3.bf16.msra.mxu1 %v5148_v5  ;;  %4756 = vmatprep.subr.bf16.mxu0 %v5149_v6  ;;  %v409_v5 = vrot.slane %v5764_v19, %v5668_v53 }
 0x1f4   : > { %4778 = vmatprep.subr.bf16.mxu1 %v5150_v8 }
 0x1f5   : > { %v1277_v0 = vadd.f32 %v5722_v43, %v409_v5 }
 0x1f6   : > { %4757 = vmatpush3.bf16.msra.mxu0 %v5151_v9  ;;  %v5190_v9 = vld [vmem:[#allocation7 + $0x7f0] sm:$0xff]  }
 0x1f7   : > { %4779 = vmatpush3.bf16.msra.mxu1 %v5152_v39  ;;  %4758 = vmatprep.subr.bf16.mxu0 %v5153_v11  ;;  %v4223_v39 = vld [vmem:[%s5846_s4] ss:$0 sm:$0xff]  ;;  %v1313_v7 = vmax.f32 %v1277_v0, 0.0 }
 0x1f8   : > { %4780 = vmatprep.subr.bf16.mxu1 %v5154_v33 }
 0x1f9   : > { %v1345_v60 = vpack.c.bf16 %v1313_v7, %v1313_v7 }
 0x1fa   : > { %4759 = vmatpush3.bf16.msra.mxu0 %v5155_v13 }
 0x1fb   : > { %4781 = vmatpush3.bf16.msra.mxu1 %v5156_v34  ;;  %4760 = vmatprep.subr.bf16.mxu0 %v5157_v18  ;;  %v1236_v18 = vadd.f32 %v5714_v29, %v401_v2 }
 0x1fc   : > { %4782 = vmatprep.subr.bf16.mxu1 %v5158_v22  ;;  %v5192_v22 = vld [vmem:[#allocation7 + $0x7b0] sm:$0xff]  }
 0x1fe   : > { %4761 = vmatpush3.bf16.msra.mxu0 %v5159_v37 }
 0x1ff   : > { %4783 = vmatpush3.bf16.msra.mxu1 %v5160_v1  ;;  %4762 = vmatprep.subr.bf16.mxu0 %v5161_v40  ;;  %v5194_v1 = vld [vmem:[#allocation7 + $0x7f8] sm:$0xff]   ;;  %v1311_v40 = vmax.f32 %v1236_v18, 0.0 }
 0x200   : > { %4784 = vmatprep.subr.bf16.mxu1 %v5162_v59  ;;  %v5196_v59 = vld [vmem:[#allocation7 + $0x7b8] sm:$0xff]  }
 0x201   : > { %v1343_v29 = vpack.c.bf16 %v1311_v40, %v1311_v40 }
 0x202   : > { %4763 = vmatpush3.bf16.msra.mxu0 %v5163_v57 }
 0x203   : > { %4785 = vmatpush3.bf16.msra.mxu1 %v5164_v58  ;;  %4792 = vmatprep.subr.bf16.mxu0 %v5165_v28 }
 0x204   : > { %4814 = vmatprep.subr.bf16.mxu1 %v5166_v10 }
 0x205   : > { %3915 = vmatmul.mubr.bf16.vlgmr.msra.gmra.mrb[56].mxu0 %v1339_v41 }
 0x206   : > { %3955 = vmatmul.mubr.bf16.vlgmr.msra.gmra.mrb[56].mxu1 %v1341_v17  ;;  %4793 = vmatpush3.bf16.msra.mxu0 %v5167_v31 }
 0x207   : > { %3994 = vmatprep.mubr.bf16.mxu0 %v1344_v47  ;;  %4815 = vmatpush3.bf16.msra.mxu1 %v5168_v36 }
 0x208   : > { %4034 = vmatprep.mubr.bf16.mxu1 %v1346_v51  ;;  %4794 = vmatprep.subr.bf16.mxu0 %v5169_v42 }
 0x209   : > { %4816 = vmatprep.subr.bf16.mxu1 %v5170_v50 }
 0x20a   : > { %4795 = vmatpush3.bf16.msra.mxu0 %v5171_v21 }
 0x20b   : > { %4817 = vmatpush3.bf16.msra.mxu1 %v5172_v32  ;;  %4796 = vmatprep.subr.bf16.mxu0 %v5173_v24 }
 0x20c   : > { %4818 = vmatprep.subr.bf16.mxu1 %v5174_v12 }
 0x20e   : > { %4797 = vmatpush3.bf16.msra.mxu0 %v5175_v35 }
 0x20f   : > { %4819 = vmatpush3.bf16.msra.mxu1 %v5176_v44  ;;  %4798 = vmatprep.subr.bf16.mxu0 %v5177_v14 }
 0x210   : > { %4820 = vmatprep.subr.bf16.mxu1 %v5178_v20 }
 0x212   : > { %4799 = vmatpush3.bf16.msra.mxu0 %v5179_v45 }
 0x213   : > { %4821 = vmatpush3.bf16.msra.mxu1 %v5180_v54  ;;  %4800 = vmatprep.subr.bf16.mxu0 %v5181_v55 }
 0x214   : > { %4822 = vmatprep.subr.bf16.mxu1 %v5182_v46 }
 0x216   : > { %4801 = vmatpush3.bf16.msra.mxu0 %v5183_v48 }
 0x217   : > { %4823 = vmatpush3.bf16.msra.mxu1 %v5184_v49  ;;  %4802 = vmatprep.subr.bf16.mxu0 %v5185_v56 }
 0x218   : > { %v4500_v6 = vpop.f32.mrb[32].mxu0  ;;  %4824 = vmatprep.subr.bf16.mxu1 %v5186_v61 }
 0x219   : > { %v4522_v8 = vpop.f32.mrb[32].mxu1  ;;  %v4501_v11 = vpop.f32.mrb[33].mxu0 }
 0x21a   : > { %v4523_v33 = vpop.f32.mrb[33].mxu1  ;;  %v4502_v13 = vadd.f32 %v4501_v11, %v4500_v6  ;;  %4803 = vmatpush3.bf16.msra.mxu0 %v5187_v62  ;;  %v4503_v52 = vpop.f32.mrb[34].mxu0 }
 0x21b   : > { %v4524_v34 = vadd.f32 %v4523_v33, %v4522_v8  ;;  %v4525_v63 = vpop.f32.mrb[34].mxu1  ;;  %4825 = vmatpush3.bf16.msra.mxu1 %v5188_v3  ;;  %v4504_v53 = vpop.f32.mrb[35].mxu0  ;;  %4804 = vmatprep.subr.bf16.mxu0 %v5189_v4 }
 0x21c   : > { %v4526_v19 = vpop.f32.mrb[35].mxu1  ;;  %v3437_v37 = vadd.f32 %v4502_v13, %v4223_v39  ;;  %4826 = vmatprep.subr.bf16.mxu1 %v5190_v9 }
 0x21e   : > { %v3477_v25 = vadd.f32 %v4524_v34, %v3437_v37  ;;  %4805 = vmatpush3.bf16.msra.mxu0 %v5191_v16 }
 0x21f   : > { %4827 = vmatpush3.bf16.msra.mxu1 %v5192_v22  ;;  %4806 = vmatprep.subr.bf16.mxu0 %v5193_v23 }
 0x220   : > { %4828 = vmatprep.subr.bf16.mxu1 %v5194_v1 }
 0x222   : > { %4807 = vmatpush3.bf16.msra.mxu0 %v5195_v38 }
 0x223   : > { %4829 = vmatpush3.bf16.msra.mxu1 %v5196_v59 }
 0x225   : > { %3995 = vmatmul.mubr.bf16.vlgmr.msra.gmra.mrb[60].mxu0 %v1343_v29 }
 0x226   : > { %4035 = vmatmul.mubr.bf16.vlgmr.msra.gmra.mrb[60].mxu1 %v1345_v60 }
 0x238   : > { %v4544_v57 = vpop.f32.mrb[36].mxu0 }
 0x239   : > { %v4566_v43 = vpop.f32.mrb[36].mxu1  ;;  %v4545_v58 = vpop.f32.mrb[37].mxu0 }
 0x23a   : > { %v4567_v26 = vpop.f32.mrb[37].mxu1  ;;  %v4546_v27 = vadd.f32 %v4545_v58, %v4544_v57  ;;  %v4547_v10 = vpop.f32.mrb[38].mxu0 }
 0x23b   : > { %v4568_v28 = vadd.f32 %v4567_v26, %v4566_v43  ;;  %v4569_v30 = vpop.f32.mrb[38].mxu1  ;;  %v4548_v15 = vpop.f32.mrb[39].mxu0 }
 0x23c   : > { %v4570_v31 = vpop.f32.mrb[39].mxu1  ;;  %v3517_v41 = vadd.f32 %v4546_v27, %v3477_v25 }
 0x23e   : > { %v3557_v17 = vadd.f32 %v4568_v28, %v3517_v41 }
 0x258   : > { %v4588_v36 = vpop.f32.mrb[40].mxu0 }
 0x259   : > { %v4610_v47 = vpop.f32.mrb[40].mxu1  ;;  %v4589_v42 = vpop.f32.mrb[41].mxu0 }
 0x25a   : > { %v4611_v50 = vpop.f32.mrb[41].mxu1  ;;  %v4590_v51 = vadd.f32 %v4589_v42, %v4588_v36  ;;  %v4591_v32 = vpop.f32.mrb[42].mxu0 }
 0x25b   : > { %v4612_v21 = vadd.f32 %v4611_v50, %v4610_v47  ;;  %v4613_v24 = vpop.f32.mrb[42].mxu1  ;;  %v4592_v12 = vpop.f32.mrb[43].mxu0 }
 0x25c   : > { %v4614_v35 = vpop.f32.mrb[43].mxu1  ;;  %v3597_v44 = vadd.f32 %v4590_v51, %v3557_v17 }
 0x25e   : > { %v3637_v14 = vadd.f32 %v4612_v21, %v3597_v44 }
 0x278   : > { %v4632_v20 = vpop.f32.mrb[44].mxu0 }
 0x279   : > { %v4654_v45 = vpop.f32.mrb[44].mxu1  ;;  %v4633_v54 = vpop.f32.mrb[45].mxu0 }
 0x27a   : > { %v4655_v55 = vpop.f32.mrb[45].mxu1  ;;  %v4634_v46 = vadd.f32 %v4633_v54, %v4632_v20  ;;  %v4635_v49 = vpop.f32.mrb[46].mxu0 }
 0x27b   : > { %v4656_v48 = vadd.f32 %v4655_v55, %v4654_v45  ;;  %v4657_v56 = vpop.f32.mrb[46].mxu1  ;;  %v4636_v61 = vpop.f32.mrb[47].mxu0 }
 0x27c   : > { %v4658_v62 = vpop.f32.mrb[47].mxu1  ;;  %v3677_v2 = vadd.f32 %v4634_v46, %v3637_v14 }
 0x27e   : > { %v3717_v3 = vadd.f32 %v4656_v48, %v3677_v2 }
 0x298   : > { %v4676_v4 = vpop.f32.mrb[48].mxu0 }
 0x299   : > { %v4698_v5 = vpop.f32.mrb[48].mxu1  ;;  %v4677_v6 = vpop.f32.mrb[49].mxu0 }
 0x29a   : > { %v4699_v8 = vpop.f32.mrb[49].mxu1  ;;  %v4678_v9 = vadd.f32 %v4677_v6, %v4676_v4  ;;  %v4679_v11 = vpop.f32.mrb[50].mxu0 }
 0x29b   : > { %v4700_v39 = vadd.f32 %v4699_v8, %v4698_v5  ;;  %v4701_v33 = vpop.f32.mrb[50].mxu1  ;;  %v4680_v13 = vpop.f32.mrb[51].mxu0 }
 0x29c   : > { %v4702_v34 = vpop.f32.mrb[51].mxu1  ;;  %v3757_v52 = vadd.f32 %v4678_v9, %v3717_v3 }
 0x29e   : > { %v3797_v63 = vadd.f32 %v4700_v39, %v3757_v52 }
 0x2b8   : > { %v4720_v16 = vpop.f32.mrb[52].mxu0 }
 0x2b9   : > { %v4742_v18 = vpop.f32.mrb[52].mxu1  ;;  %v4721_v53 = vpop.f32.mrb[53].mxu0 }
 0x2ba   : > { %v4743_v19 = vpop.f32.mrb[53].mxu1  ;;  %v4722_v22 = vadd.f32 %v4721_v53, %v4720_v16  ;;  %v4723_v0 = vpop.f32.mrb[54].mxu0 }
 0x2bb   : > { %v4744_v23 = vadd.f32 %v4743_v19, %v4742_v18  ;;  %v4745_v37 = vpop.f32.mrb[54].mxu1  ;;  %v4724_v1 = vpop.f32.mrb[55].mxu0 }
 0x2bc   : > { %v4746_v25 = vpop.f32.mrb[55].mxu1  ;;  %v3837_v38 = vadd.f32 %v4722_v22, %v3797_v63 }
 0x2be   : > { %v3877_v40 = vadd.f32 %v4744_v23, %v3837_v38 }
 0x2d8   : > { %v4764_v59 = vpop.f32.mrb[56].mxu0 }
 0x2d9   : > { %v4786_v7 = vpop.f32.mrb[56].mxu1  ;;  %v4765_v29 = vpop.f32.mrb[57].mxu0 }
 0x2da   : > { %v4787_v60 = vpop.f32.mrb[57].mxu1  ;;  %v4766_v57 = vadd.f32 %v4765_v29, %v4764_v59  ;;  %v4767_v58 = vpop.f32.mrb[58].mxu0 }
 0x2db   : > { %v4788_v43 = vadd.f32 %v4787_v60, %v4786_v7  ;;  %v4789_v26 = vpop.f32.mrb[58].mxu1  ;;  %v4768_v27 = vpop.f32.mrb[59].mxu0 }
 0x2dc   : > { %v4790_v28 = vpop.f32.mrb[59].mxu1  ;;  %v3917_v10 = vadd.f32 %v4766_v57, %v3877_v40 }
 0x2de   : > { %v3957_v30 = vadd.f32 %v4788_v43, %v3917_v10 }
 0x2f8   : > { %v4808_v15 = vpop.f32.mrb[60].mxu0 }
 0x2f9   : > { %v4830_v31 = vpop.f32.mrb[60].mxu1  ;;  %v4809_v41 = vpop.f32.mrb[61].mxu0 }
 0x2fa   : > { %v4810_v17 = vadd.f32 %v4809_v41, %v4808_v15  ;;  %v4831_v36 = vpop.f32.mrb[61].mxu1  ;;  %v4811_v47 = vpop.f32.mrb[62].mxu0 }
 0x2fb   : > { %v4832_v42 = vadd.f32 %v4831_v36, %v4830_v31  ;;  %v4833_v50 = vpop.f32.mrb[62].mxu1  ;;  %v4812_v51 = vpop.f32.mrb[63].mxu0 }
 0x2fc   : > { %v3997_v21 = vadd.f32 %v4810_v17, %v3957_v30  ;;  %v4834_v32 = vpop.f32.mrb[63].mxu1 }
 0x2fe   : > { %v4037_v24 = vadd.f32 %v4832_v42, %v3997_v21 }
 0x300   : > { %4042 = vst [vmem:[%s255_s25] sm:$0xff] %v4037_v24 }
 0x301   : > { %5294 = shalt.err (!%p5291_p11)
}
 0x302   : > { %s5295_s23 = scalar_lea.hbm %s5800_s6, 128  ;;  %s5299_s14 = scalar_lea.hbm %s5847_s5, 512 }
 0x303   : > { %p5296_p13 = scmp.ne.s32.totalorder %s5800_s6, %s5295_s23  ;;  %p5300_p6 = scmp.lt.u32.totalorder %s5800_s6, %s5847_s5 }
 0x304   : > { %p5301_p5 = scmp.lt.u32.totalorder %s5299_s14, %s5295_s23  ;;  %p5303_p12 = scmp.lt.u32.totalorder %s5295_s23, %s5800_s6 }
 0x305   : > { %p5297_p0 = pnand %p5296_p13, %p5861_p10 }
 0x306   : > { %p5302_p9 = por %p5301_p5, %p5300_p6 }
 0x307   : > { %p5298_p1 = pneg %p5297_p0 }
 0x308   : > { %p5304_p2 = por %p5303_p12, %p5302_p9 }
 0x30a   : > { %p5305_p3 = pnand %p5304_p2, %p5298_p1 }
 0x30c   : > { %5308 = shalt.err (!%p5305_p3)
}
 0x30d   : > { %4848 = dma.vmem_to_hbm [thread:$0]  (%p5861_p10), %s5802_s9, 128, %s5800_s6, %s4044_s8  }
 0x30e PF: > { %p4870_p4 = scmp.ge.s32.totalorder %s5351_s21, 2  ;;  %s4069_s17 = sand.u32 1, %s5339_s18  }
 0x30f   : > { %p5862_p7 = scmp.ne.s32.totalorder %s5852_s29, 0  ;;  %s4070_s25 = scalar_lea.sflag [#allocation4], %s4069_s17 }
 0x311   : > { %p4861_p8 = pnand %p4870_p4, %p5862_p7 }
 0x313   : > { %5334 = dma.done.wait (!%p4861_p8), %s4070_s25, 128  }
 0x314   : > { %5336 = vsyncadd (!%p4861_p8), %s4070_s25, 4294967168  ;;  %p17_p11 = scmp.ge.s32.totalorder %s5415_s24, 6   ;;  %s5863_s18 = smov %s5343_s19 }
 0x315   : > { %s5864_s19 = smov %s5347_s20  ;;  %s5865_s20 = smov %s5426_s27 }
 0x316   : > { %s5866_s21 = smov %s5415_s24  ;;  %19 = sbr.rel (!%p17_p11) target bundleno = 5 (0x5), region = 88 }
 0x31d   :  { %4075 = vsyncpa [#allocation3], 1 }
 0x31e   :  { %4077 = vsyncpa [#allocation3 + $0x1], 1 }
 0x31f   :  { %4078 = vsyncpa [#allocation6], 1 }
 0x320   :  { %4079 = vsyncpa [#allocation4], 1 }
 0x321   :  { %4081 = vsyncpa [#allocation4 + $0x1], 1 }

</bundles_post_ra>
